<compile_context>
chip_gen: v5e
topology: v5e:2x2
jax: 0.10.0
libtpu: 0.0.40
codegen_flags: <defaults>
</compile_context>

<pallas_src>
import jax
import jax.numpy as jnp
import numpy as np
from jax.experimental import pallas as pl
from jax.experimental.pallas import tpu as pltpu


def _make_fused_gru_kernel(seq_len_pad: int, t_block: int, hidden: int):
    """Fused bidirectional GRU recurrence (PyTorch gate order: r, z, n)."""
    H = hidden

    def kernel(len_ref, gi_ref, whh_ref, bhhn_ref, out_ref, hN_ref, h_scratch):
        d = pl.program_id(0)    # direction: 0 = forward, 1 = backward (stream flipped)
        tb = pl.program_id(1)   # time-block index (stream order)

        @pl.when(tb == 0)
        def _():
            h_scratch[...] = jnp.zeros_like(h_scratch)

        # Hoisted loads: once per grid step, not once per timestep.
        lens = len_ref[...]     # (batch, 1) int32
        whh = whh_ref[0]        # (H, 3H)
        bhh_n = bhhn_ref[0]     # (1, H)   (only the n-gate b_hh stays in-loop)

        # Direction-dependent time mapping, hoisted: real_t = t0 + sign * s.
        base = tb * t_block
        t0 = jnp.where(d == 0, base, seq_len_pad - 1 - base)
        sign = jnp.where(d == 0, 1, -1)

        h = h_scratch[...]      # (batch, H)
        outs = []
        # Static Python loop over the time block: small, fully unrolled,
        # all ref slices are static.
        for s in range(t_block):
            real_t = t0 + sign * s          # real (unflipped) time index

            gi = gi_ref[0, s]               # (batch, 3H); b_ih + b_hh[r,z] pre-folded
            gh = jnp.dot(h, whh, preferred_element_type=jnp.float32)

            r = jax.nn.sigmoid(gi[:, 0 * H:1 * H] + gh[:, 0 * H:1 * H])
            z = jax.nn.sigmoid(gi[:, 1 * H:2 * H] + gh[:, 1 * H:2 * H])
            n = jnp.tanh(gi[:, 2 * H:3 * H] + r * (gh[:, 2 * H:3 * H] + bhh_n))
            h_new = (1.0 - z) * n + z * h

            # pack_padded_sequence semantics: inactive batch rows keep their
            # hidden state; their padded outputs are zero.
            active = real_t < lens                        # (batch, 1) bool
            h = jnp.where(active, h_new, h)
            outs.append(jnp.where(active, h_new, jnp.zeros_like(h_new)))

        h_scratch[...] = h
        # Single lane-dense flush: (batch, t_block*H), last dim % 128 == 0.
        out_ref[0, 0] = jnp.concatenate(outs, axis=-1)

        @pl.when(tb == pl.num_programs(1) - 1)
        def _():
            hN_ref[0] = h

    return kernel


def bigru_encoder(x_emb, src_len, wih, whh, bih, bhh, *, t_block=8):
    """Fused bidirectional GRU over the whole sequence.

    x_emb: (S, B, E) f32
    src_len: (B,) int32
    wih: (2, E, 3H)  transposed torch weight_ih_l0 / weight_ih_l0_reverse
    whh: (2, H, 3H)  transposed torch weight_hh_l0 / weight_hh_l0_reverse
    bih, bhh: (2, 3H)
    Returns: outputs (S, B, 2H), h_t (1, B, 2H)
    """
    S, B, E = x_emb.shape
    H = whh.shape[1]
    G3 = 3 * H

    # ---- Hoisted input projection: one big matmul instead of per-step ----
    gi = jnp.einsum("tbe,deg->dtbg", x_emb, wih,
                    preferred_element_type=jnp.float32)        # (2, S, B, 3H)
    # Fold b_ih fully plus the r/z parts of b_hh; only the n-gate's b_hh must
    # remain inside the recurrence (it is multiplied by r).
    bias = bih + bhh.at[:, 2 * H:].set(0.0)                    # (2, 3H)
    gi = gi + bias[:, None, None, :]
    bhh_n = bhh[:, 2 * H:].reshape(2, 1, H)

    # ---- Pad time to a multiple of t_block; pre-flip the backward stream ----
    nt = -(-S // t_block)
    S_pad = nt * t_block
    if S_pad != S:
        gi = jnp.pad(gi, ((0, 0), (0, S_pad - S), (0, 0), (0, 0)))
    gi = jnp.stack([gi[0], gi[1, ::-1]], axis=0)               # (2, S_pad, B, 3H)

    lens2d = src_len.reshape(B, 1).astype(jnp.int32)

    grid_spec = pltpu.PrefetchScalarGridSpec(
        num_scalar_prefetch=0,
        grid=(2, nt),                                           # (direction, time block)
        in_specs=[
            pl.BlockSpec((B, 1), lambda d, t: (0, 0)),                     # lengths
            pl.BlockSpec((1, t_block, B, G3), lambda d, t: (d, t, 0, 0)),  # gates gi
            pl.BlockSpec((1, H, G3), lambda d, t: (d, 0, 0)),              # W_hh^T
            pl.BlockSpec((1, 1, H), lambda d, t: (d, 0, 0)),               # b_hh (n gate)
        ],
        out_specs=[
            pl.BlockSpec((1, 1, B, t_block * H), lambda d, t: (d, t, 0, 0)),  # out slab
            pl.BlockSpec((1, B, H), lambda d, t: (d, 0, 0)),                  # final h
        ],
        scratch_shapes=[pltpu.VMEM((B, H), jnp.float32)],
    )

    out_slab, h_fin = pl.pallas_call(
        _make_fused_gru_kernel(S_pad, t_block, H),
        grid_spec=grid_spec,
        out_shape=(
            jax.ShapeDtypeStruct((2, nt, B, t_block * H), jnp.float32),
            jax.ShapeDtypeStruct((2, B, H), jnp.float32),
        ),
        compiler_params=pltpu.CompilerParams(
            # direction axis is independent (one per TensorCore on megacore
            # parts); the time axis carries the recurrence.
            dimension_semantics=("parallel", "arbitrary")),
    )(lens2d, gi, whh, bhh_n)

    # Un-slab: (2, nt, B, t_block*H) -> (2, S_pad, B, H); un-flip bwd; crop.
    out = out_slab.reshape(2, nt, B, t_block, H)
    out = out.transpose(0, 1, 3, 2, 4).reshape(2, S_pad, B, H)
    out = jnp.stack([out[0], out[1, ::-1]], axis=0)[:, :S]

    outputs = jnp.concatenate([out[0], out[1]], axis=-1)        # (S, B, 2H)
    h_t = jnp.concatenate([h_fin[0], h_fin[1]], axis=-1)[None]  # (1, B, 2H)
    return outputs, h_t


def init_params(key, vocab_size, input_size, hidden_size):
    k = 1.0 / np.sqrt(hidden_size)
    keys = jax.random.split(key, 9)
    u = lambda kk, shape: jax.random.uniform(kk, shape, jnp.float32, -k, k)
    return {
        "embedding": jax.random.normal(keys[0], (vocab_size, input_size),
                                       jnp.float32),
        # forward direction (torch weight_*_l0), stored transposed
        "wih_f": u(keys[1], (input_size, 3 * hidden_size)),
        "whh_f": u(keys[2], (hidden_size, 3 * hidden_size)),
        "bih_f": u(keys[3], (3 * hidden_size,)),
        "bhh_f": u(keys[4], (3 * hidden_size,)),
        # backward direction (torch weight_*_l0_reverse)
        "wih_b": u(keys[5], (input_size, 3 * hidden_size)),
        "whh_b": u(keys[6], (hidden_size, 3 * hidden_size)),
        "bih_b": u(keys[7], (3 * hidden_size,)),
        "bhh_b": u(keys[8], (3 * hidden_size,)),
    }


@jax.jit
def encoder_forward(params, src, src_len):
    """src: (seq_len, batch) int32, src_len: (batch,) int32 (sorted desc)."""
    # Embedding lookup: plain-JAX glue (gather is not the hot path here).
    x_emb = jnp.take(params["embedding"], src, axis=0)          # (S, B, E)
    wih = jnp.stack([params["wih_f"], params["wih_b"]])         # (2, E, 3H)
    whh = jnp.stack([params["whh_f"], params["whh_b"]])         # (2, H, 3H)
    bih = jnp.stack([params["bih_f"], params["bih_b"]])         # (2, 3H)
    bhh = jnp.stack([params["bhh_f"], params["bhh_b"]])         # (2, 3H)
    # TODO(synk): inter-layer dropout is a no-op for num_layers=1 (matches torch).
    return bigru_encoder(x_emb, src_len, wih, whh, bih, bhh)


def _gru_ref_np(x, lengths, wih_t, whh_t, bih, bhh, reverse):
    """Pure numpy reference for one GRU direction with packed-seq masking."""
    seq_len, batch, _ = x.shape
    H = whh_t.shape[0]
    sig = lambda v: 1.0 / (1.0 + np.exp(-v))
    h = np.zeros((batch, H), np.float32)
    out = np.zeros((seq_len, batch, H), np.float32)
    times = range(seq_len - 1, -1, -1) if reverse else range(seq_len)
    for t in times:
        gi = x[t] @ wih_t + bih
        gh = h @ whh_t + bhh
        r = sig(gi[:, :H] + gh[:, :H])
        z = sig(gi[:, H:2 * H] + gh[:, H:2 * H])
        n = np.tanh(gi[:, 2 * H:] + r * gh[:, 2 * H:])
        h_new = (1.0 - z) * n + z * h
        active = (t < lengths)[:, None]
        h = np.where(active, h_new, h)
        out[t] = np.where(active, h_new, 0.0)
    return out, h


if __name__ == "__main__":
    SEQ_LEN, BATCH = 8, 2
    VOCAB, INPUT_SIZE, HIDDEN = 20, 16, 32

    key = jax.random.PRNGKey(0)
    pkey, skey = jax.random.split(key)
    params = init_params(pkey, VOCAB, INPUT_SIZE, HIDDEN)

    # pack_padded_sequence default requires lengths sorted in decreasing order.
    src_len = jnp.array([8, 5], dtype=jnp.int32)
    src = jax.random.randint(skey, (SEQ_LEN, BATCH), 0, VOCAB, dtype=jnp.int32)

    outputs, h_t = encoder_forward(params, src, src_len)
    outputs, h_t = jax.block_until_ready((outputs, h_t))

    assert outputs.shape == (SEQ_LEN, BATCH, 2 * HIDDEN)
    assert h_t.shape == (1, BATCH, 2 * HIDDEN)

    # numpy reference check
    x_np = np.asarray(jnp.take(params["embedding"], src, axis=0))
    len_np = np.asarray(src_len)
    of, hf = _gru_ref_np(x_np, len_np, np.asarray(params["wih_f"]),
                         np.asarray(params["whh_f"]), np.asarray(params["bih_f"]),
                         np.asarray(params["bhh_f"]), reverse=False)
    ob, hb = _gru_ref_np(x_np, len_np, np.asarray(params["wih_b"]),
                         np.asarray(params["whh_b"]), np.asarray(params["bih_b"]),
                         np.asarray(params["bhh_b"]), reverse=True)
    out_ref = np.concatenate([of, ob], axis=-1)
    h_ref = np.concatenate([hf, hb], axis=-1)[None]

    np.testing.assert_allclose(np.asarray(outputs), out_ref, atol=1e-4, rtol=1e-4)
    np.testing.assert_allclose(np.asarray(h_t), h_ref, atol=1e-4, rtol=1e-4)

    print("KERNEL_OK")
</pallas_src>

<mosaic_0001>
module attributes {stable_mosaic.version = 11 : i64} {
  func.func @kernel(%arg0: i32, %arg1: i32, %arg2: memref<2x1xi32, #tpu.memory_space<vmem>>, %arg3: memref<1x8x2x96xf32, #tpu.memory_space<vmem>>, %arg4: memref<1x32x96xf32, #tpu.memory_space<vmem>>, %arg5: memref<1x1x32xf32, #tpu.memory_space<vmem>>, %arg6: memref<1x1x2x256xf32, #tpu.memory_space<vmem>>, %arg7: memref<1x2x32xf32, #tpu.memory_space<vmem>>, %arg8: memref<2x32xf32, #tpu.memory_space<vmem>>) attributes {dimension_semantics = [#tpu.dimension_semantics<parallel>, #tpu.dimension_semantics<arbitrary>], iteration_bounds = array<i64: 2, 1>, scalar_prefetch = 0 : i64, scratch_operands = 1 : i64, tpu.core_type = #tpu.core_type<tc>, window_params = [{pipeline_mode = #tpu.pipeline_mode<synchronous>, transform_indices = @transform_0, window_bounds = array<i64: 2, 1>}, {transform_indices = @transform_1, window_bounds = array<i64: 1, 8, 2, 96>}, {transform_indices = @transform_2, window_bounds = array<i64: 1, 32, 96>}, {transform_indices = @transform_3, window_bounds = array<i64: 1, 1, 32>}, {transform_indices = @transform_4, window_bounds = array<i64: 1, 1, 2, 256>}, {transform_indices = @transform_5, window_bounds = array<i64: 1, 2, 32>}]} {
    %c0_i32 = arith.constant 0 : i32
    %0 = arith.cmpi eq, %arg1, %c0_i32 : i32
    %1 = arith.extui %0 : i1 to i32
    %c0_i32_0 = arith.constant 0 : i32
    %2 = arith.cmpi ne, %1, %c0_i32_0 : i32
    scf.if %2 {
      %cst_87 = arith.constant 0.000000e+00 : f32
      %359 = vector.broadcast %cst_87 : f32 to vector<2x32xf32>
      %c0_88 = arith.constant 0 : index
      %c0_89 = arith.constant 0 : index
      %360 = vector.load %arg8[%c0_88, %c0_89] : memref<2x32xf32, #tpu.memory_space<vmem>>, vector<2x32xf32>
      tpu.vector_store %arg8[%c0_88, %c0_89], %359 {strides = array<i32>} : memref<2x32xf32, #tpu.memory_space<vmem>>, vector<2x32xf32>,
    } else {
    }
    %c0 = arith.constant 0 : index
    %c0_1 = arith.constant 0 : index
    %3 = vector.load %arg2[%c0, %c0_1] : memref<2x1xi32, #tpu.memory_space<vmem>>, vector<2x1xi32>
    %c0_2 = arith.constant 0 : index
    %c0_3 = arith.constant 0 : index
    %c0_4 = arith.constant 0 : index
    %4 = vector.load %arg4[%c0_2, %c0_3, %c0_4] : memref<1x32x96xf32, #tpu.memory_space<vmem>>, vector<1x32x96xf32>
    %5 = vector.shape_cast %4 : vector<1x32x96xf32> to vector<32x96xf32>
    %c0_5 = arith.constant 0 : index
    %c0_6 = arith.constant 0 : index
    %c0_7 = arith.constant 0 : index
    %6 = vector.load %arg5[%c0_5, %c0_6, %c0_7] : memref<1x1x32xf32, #tpu.memory_space<vmem>>, vector<1x1x32xf32>
    %7 = vector.shape_cast %6 : vector<1x1x32xf32> to vector<1x32xf32>
    %c8_i32 = arith.constant 8 : i32
    %8 = arith.muli %arg1, %c8_i32 : i32
    %c0_i32_8 = arith.constant 0 : i32
    %9 = arith.cmpi eq, %arg0, %c0_i32_8 : i32
    %c7_i32 = arith.constant 7 : i32
    %10 = arith.subi %c7_i32, %8 : i32
    %11 = arith.select %9, %8, %10 : i32
    %c0_i32_9 = arith.constant 0 : i32
    %12 = arith.cmpi eq, %arg0, %c0_i32_9 : i32
    %c1_i32 = arith.constant 1 : i32
    %c-1_i32 = arith.constant -1 : i32
    %13 = arith.select %12, %c1_i32, %c-1_i32 : i32
    %c0_10 = arith.constant 0 : index
    %c0_11 = arith.constant 0 : index
    %14 = vector.load %arg8[%c0_10, %c0_11] : memref<2x32xf32, #tpu.memory_space<vmem>>, vector<2x32xf32>
    %c0_i32_12 = arith.constant 0 : i32
    %15 = arith.muli %13, %c0_i32_12 : i32
    %16 = arith.addi %11, %15 : i32
    %c0_13 = arith.constant 0 : index
    %c0_14 = arith.constant 0 : index
    %c0_15 = arith.constant 0 : index
    %c0_16 = arith.constant 0 : index
    %17 = vector.load %arg3[%c0_13, %c0_14, %c0_15, %c0_16] : memref<1x8x2x96xf32, #tpu.memory_space<vmem>>, vector<1x1x2x96xf32>
    %18 = vector.shape_cast %17 : vector<1x1x2x96xf32> to vector<2x96xf32>
    %cst = arith.constant dense<0.000000e+00> : vector<2x96xf32>
    %19 = tpu.matmul %14, %5, %cst {dimension_numbers = #tpu.dot_dimension_numbers<[1], [0], [0], [1], [0, 0, 1, 1], [], []>} : vector<2x32xf32>, vector<32x96xf32>, vector<2x96xf32> -> vector<2x96xf32>
    %20 = vector.extract_strided_slice %18 {offsets = [0, 0], sizes = [2, 32], strides = [1, 1]} : vector<2x96xf32> to vector<2x32xf32>
    %21 = vector.extract_strided_slice %19 {offsets = [0, 0], sizes = [2, 32], strides = [1, 1]} : vector<2x96xf32> to vector<2x32xf32>
    %22 = arith.addf %20, %21 : vector<2x32xf32>
    %23 = arith.negf %22 : vector<2x32xf32>
    %24 = math.exp %23 : vector<2x32xf32>
    %cst_17 = arith.constant 1.000000e+00 : f32
    %25 = vector.broadcast %cst_17 : f32 to vector<2x32xf32>
    %26 = arith.addf %25, %24 : vector<2x32xf32>
    %27 = arith.divf %25, %26 : vector<2x32xf32>
    %28 = vector.extract_strided_slice %18 {offsets = [0, 32], sizes = [2, 32], strides = [1, 1]} : vector<2x96xf32> to vector<2x32xf32>
    %29 = vector.extract_strided_slice %19 {offsets = [0, 32], sizes = [2, 32], strides = [1, 1]} : vector<2x96xf32> to vector<2x32xf32>
    %30 = arith.addf %28, %29 : vector<2x32xf32>
    %31 = arith.negf %30 : vector<2x32xf32>
    %32 = math.exp %31 : vector<2x32xf32>
    %cst_18 = arith.constant 1.000000e+00 : f32
    %33 = vector.broadcast %cst_18 : f32 to vector<2x32xf32>
    %34 = arith.addf %33, %32 : vector<2x32xf32>
    %35 = arith.divf %33, %34 : vector<2x32xf32>
    %36 = vector.extract_strided_slice %18 {offsets = [0, 64], sizes = [2, 32], strides = [1, 1]} : vector<2x96xf32> to vector<2x32xf32>
    %37 = vector.extract_strided_slice %19 {offsets = [0, 64], sizes = [2, 32], strides = [1, 1]} : vector<2x96xf32> to vector<2x32xf32>
    %38 = vector.broadcast %7 : vector<1x32xf32> to vector<2x32xf32>
    %39 = arith.addf %37, %38 : vector<2x32xf32>
    %40 = arith.mulf %27, %39 : vector<2x32xf32>
    %41 = arith.addf %36, %40 : vector<2x32xf32>
    %42 = math.tanh %41 : vector<2x32xf32>
    %cst_19 = arith.constant 1.000000e+00 : f32
    %43 = vector.broadcast %cst_19 : f32 to vector<2x32xf32>
    %44 = arith.subf %43, %35 : vector<2x32xf32>
    %45 = arith.mulf %44, %42 : vector<2x32xf32>
    %46 = arith.mulf %35, %14 : vector<2x32xf32>
    %47 = arith.addf %45, %46 : vector<2x32xf32>
    %48 = vector.broadcast %16 : i32 to vector<2x1xi32>
    %49 = arith.cmpi slt, %48, %3 : vector<2x1xi32>
    %50 = vector.shape_cast %49 : vector<2x1xi1> to vector<2x1xi1>
    %51 = vector.broadcast %50 : vector<2x1xi1> to vector<2x32xi1>
    %52 = arith.select %51, %47, %14 : vector<2x32xi1>, vector<2x32xf32>
    %cst_20 = arith.constant 0.000000e+00 : f32
    %53 = vector.broadcast %cst_20 : f32 to vector<2x32xf32>
    %54 = vector.shape_cast %49 : vector<2x1xi1> to vector<2x1xi1>
    %55 = vector.broadcast %54 : vector<2x1xi1> to vector<2x32xi1>
    %56 = arith.select %55, %47, %53 : vector<2x32xi1>, vector<2x32xf32>
    %c1_i32_21 = arith.constant 1 : i32
    %57 = arith.muli %13, %c1_i32_21 : i32
    %58 = arith.addi %11, %57 : i32
    %c0_22 = arith.constant 0 : index
    %c1 = arith.constant 1 : index
    %c0_23 = arith.constant 0 : index
    %c0_24 = arith.constant 0 : index
    %59 = vector.load %arg3[%c0_22, %c1, %c0_23, %c0_24] : memref<1x8x2x96xf32, #tpu.memory_space<vmem>>, vector<1x1x2x96xf32>
    %60 = vector.shape_cast %59 : vector<1x1x2x96xf32> to vector<2x96xf32>
    %cst_25 = arith.constant dense<0.000000e+00> : vector<2x96xf32>
    %61 = tpu.matmul %52, %5, %cst_25 {dimension_numbers = #tpu.dot_dimension_numbers<[1], [0], [0], [1], [0, 0, 1, 1], [], []>} : vector<2x32xf32>, vector<32x96xf32>, vector<2x96xf32> -> vector<2x96xf32>
    %62 = vector.extract_strided_slice %60 {offsets = [0, 0], sizes = [2, 32], strides = [1, 1]} : vector<2x96xf32> to vector<2x32xf32>
    %63 = vector.extract_strided_slice %61 {offsets = [0, 0], sizes = [2, 32], strides = [1, 1]} : vector<2x96xf32> to vector<2x32xf32>
    %64 = arith.addf %62, %63 : vector<2x32xf32>
    %65 = arith.negf %64 : vector<2x32xf32>
    %66 = math.exp %65 : vector<2x32xf32>
    %cst_26 = arith.constant 1.000000e+00 : f32
    %67 = vector.broadcast %cst_26 : f32 to vector<2x32xf32>
    %68 = arith.addf %67, %66 : vector<2x32xf32>
    %69 = arith.divf %67, %68 : vector<2x32xf32>
    %70 = vector.extract_strided_slice %60 {offsets = [0, 32], sizes = [2, 32], strides = [1, 1]} : vector<2x96xf32> to vector<2x32xf32>
    %71 = vector.extract_strided_slice %61 {offsets = [0, 32], sizes = [2, 32], strides = [1, 1]} : vector<2x96xf32> to vector<2x32xf32>
    %72 = arith.addf %70, %71 : vector<2x32xf32>
    %73 = arith.negf %72 : vector<2x32xf32>
    %74 = math.exp %73 : vector<2x32xf32>
    %cst_27 = arith.constant 1.000000e+00 : f32
    %75 = vector.broadcast %cst_27 : f32 to vector<2x32xf32>
    %76 = arith.addf %75, %74 : vector<2x32xf32>
    %77 = arith.divf %75, %76 : vector<2x32xf32>
    %78 = vector.extract_strided_slice %60 {offsets = [0, 64], sizes = [2, 32], strides = [1, 1]} : vector<2x96xf32> to vector<2x32xf32>
    %79 = vector.extract_strided_slice %61 {offsets = [0, 64], sizes = [2, 32], strides = [1, 1]} : vector<2x96xf32> to vector<2x32xf32>
    %80 = vector.broadcast %7 : vector<1x32xf32> to vector<2x32xf32>
    %81 = arith.addf %79, %80 : vector<2x32xf32>
    %82 = arith.mulf %69, %81 : vector<2x32xf32>
    %83 = arith.addf %78, %82 : vector<2x32xf32>
    %84 = math.tanh %83 : vector<2x32xf32>
    %cst_28 = arith.constant 1.000000e+00 : f32
    %85 = vector.broadcast %cst_28 : f32 to vector<2x32xf32>
    %86 = arith.subf %85, %77 : vector<2x32xf32>
    %87 = arith.mulf %86, %84 : vector<2x32xf32>
    %88 = arith.mulf %77, %52 : vector<2x32xf32>
    %89 = arith.addf %87, %88 : vector<2x32xf32>
    %90 = vector.broadcast %58 : i32 to vector<2x1xi32>
    %91 = arith.cmpi slt, %90, %3 : vector<2x1xi32>
    %92 = vector.shape_cast %91 : vector<2x1xi1> to vector<2x1xi1>
    %93 = vector.broadcast %92 : vector<2x1xi1> to vector<2x32xi1>
    %94 = arith.select %93, %89, %52 : vector<2x32xi1>, vector<2x32xf32>
    %cst_29 = arith.constant 0.000000e+00 : f32
    %95 = vector.broadcast %cst_29 : f32 to vector<2x32xf32>
    %96 = vector.shape_cast %91 : vector<2x1xi1> to vector<2x1xi1>
    %97 = vector.broadcast %96 : vector<2x1xi1> to vector<2x32xi1>
    %98 = arith.select %97, %89, %95 : vector<2x32xi1>, vector<2x32xf32>
    %c2_i32 = arith.constant 2 : i32
    %99 = arith.muli %13, %c2_i32 : i32
    %100 = arith.addi %11, %99 : i32
    %c0_30 = arith.constant 0 : index
    %c2 = arith.constant 2 : index
    %c0_31 = arith.constant 0 : index
    %c0_32 = arith.constant 0 : index
    %101 = vector.load %arg3[%c0_30, %c2, %c0_31, %c0_32] : memref<1x8x2x96xf32, #tpu.memory_space<vmem>>, vector<1x1x2x96xf32>
    %102 = vector.shape_cast %101 : vector<1x1x2x96xf32> to vector<2x96xf32>
    %cst_33 = arith.constant dense<0.000000e+00> : vector<2x96xf32>
    %103 = tpu.matmul %94, %5, %cst_33 {dimension_numbers = #tpu.dot_dimension_numbers<[1], [0], [0], [1], [0, 0, 1, 1], [], []>} : vector<2x32xf32>, vector<32x96xf32>, vector<2x96xf32> -> vector<2x96xf32>
    %104 = vector.extract_strided_slice %102 {offsets = [0, 0], sizes = [2, 32], strides = [1, 1]} : vector<2x96xf32> to vector<2x32xf32>
    %105 = vector.extract_strided_slice %103 {offsets = [0, 0], sizes = [2, 32], strides = [1, 1]} : vector<2x96xf32> to vector<2x32xf32>
    %106 = arith.addf %104, %105 : vector<2x32xf32>
    %107 = arith.negf %106 : vector<2x32xf32>
    %108 = math.exp %107 : vector<2x32xf32>
    %cst_34 = arith.constant 1.000000e+00 : f32
    %109 = vector.broadcast %cst_34 : f32 to vector<2x32xf32>
    %110 = arith.addf %109, %108 : vector<2x32xf32>
    %111 = arith.divf %109, %110 : vector<2x32xf32>
    %112 = vector.extract_strided_slice %102 {offsets = [0, 32], sizes = [2, 32], strides = [1, 1]} : vector<2x96xf32> to vector<2x32xf32>
    %113 = vector.extract_strided_slice %103 {offsets = [0, 32], sizes = [2, 32], strides = [1, 1]} : vector<2x96xf32> to vector<2x32xf32>
    %114 = arith.addf %112, %113 : vector<2x32xf32>
    %115 = arith.negf %114 : vector<2x32xf32>
    %116 = math.exp %115 : vector<2x32xf32>
    %cst_35 = arith.constant 1.000000e+00 : f32
    %117 = vector.broadcast %cst_35 : f32 to vector<2x32xf32>
    %118 = arith.addf %117, %116 : vector<2x32xf32>
    %119 = arith.divf %117, %118 : vector<2x32xf32>
    %120 = vector.extract_strided_slice %102 {offsets = [0, 64], sizes = [2, 32], strides = [1, 1]} : vector<2x96xf32> to vector<2x32xf32>
    %121 = vector.extract_strided_slice %103 {offsets = [0, 64], sizes = [2, 32], strides = [1, 1]} : vector<2x96xf32> to vector<2x32xf32>
    %122 = vector.broadcast %7 : vector<1x32xf32> to vector<2x32xf32>
    %123 = arith.addf %121, %122 : vector<2x32xf32>
    %124 = arith.mulf %111, %123 : vector<2x32xf32>
    %125 = arith.addf %120, %124 : vector<2x32xf32>
    %126 = math.tanh %125 : vector<2x32xf32>
    %cst_36 = arith.constant 1.000000e+00 : f32
    %127 = vector.broadcast %cst_36 : f32 to vector<2x32xf32>
    %128 = arith.subf %127, %119 : vector<2x32xf32>
    %129 = arith.mulf %128, %126 : vector<2x32xf32>
    %130 = arith.mulf %119, %94 : vector<2x32xf32>
    %131 = arith.addf %129, %130 : vector<2x32xf32>
    %132 = vector.broadcast %100 : i32 to vector<2x1xi32>
    %133 = arith.cmpi slt, %132, %3 : vector<2x1xi32>
    %134 = vector.shape_cast %133 : vector<2x1xi1> to vector<2x1xi1>
    %135 = vector.broadcast %134 : vector<2x1xi1> to vector<2x32xi1>
    %136 = arith.select %135, %131, %94 : vector<2x32xi1>, vector<2x32xf32>
    %cst_37 = arith.constant 0.000000e+00 : f32
    %137 = vector.broadcast %cst_37 : f32 to vector<2x32xf32>
    %138 = vector.shape_cast %133 : vector<2x1xi1> to vector<2x1xi1>
    %139 = vector.broadcast %138 : vector<2x1xi1> to vector<2x32xi1>
    %140 = arith.select %139, %131, %137 : vector<2x32xi1>, vector<2x32xf32>
    %c3_i32 = arith.constant 3 : i32
    %141 = arith.muli %13, %c3_i32 : i32
    %142 = arith.addi %11, %141 : i32
    %c0_38 = arith.constant 0 : index
    %c3 = arith.constant 3 : index
    %c0_39 = arith.constant 0 : index
    %c0_40 = arith.constant 0 : index
    %143 = vector.load %arg3[%c0_38, %c3, %c0_39, %c0_40] : memref<1x8x2x96xf32, #tpu.memory_space<vmem>>, vector<1x1x2x96xf32>
    %144 = vector.shape_cast %143 : vector<1x1x2x96xf32> to vector<2x96xf32>
    %cst_41 = arith.constant dense<0.000000e+00> : vector<2x96xf32>
    %145 = tpu.matmul %136, %5, %cst_41 {dimension_numbers = #tpu.dot_dimension_numbers<[1], [0], [0], [1], [0, 0, 1, 1], [], []>} : vector<2x32xf32>, vector<32x96xf32>, vector<2x96xf32> -> vector<2x96xf32>
    %146 = vector.extract_strided_slice %144 {offsets = [0, 0], sizes = [2, 32], strides = [1, 1]} : vector<2x96xf32> to vector<2x32xf32>
    %147 = vector.extract_strided_slice %145 {offsets = [0, 0], sizes = [2, 32], strides = [1, 1]} : vector<2x96xf32> to vector<2x32xf32>
    %148 = arith.addf %146, %147 : vector<2x32xf32>
    %149 = arith.negf %148 : vector<2x32xf32>
    %150 = math.exp %149 : vector<2x32xf32>
    %cst_42 = arith.constant 1.000000e+00 : f32
    %151 = vector.broadcast %cst_42 : f32 to vector<2x32xf32>
    %152 = arith.addf %151, %150 : vector<2x32xf32>
    %153 = arith.divf %151, %152 : vector<2x32xf32>
    %154 = vector.extract_strided_slice %144 {offsets = [0, 32], sizes = [2, 32], strides = [1, 1]} : vector<2x96xf32> to vector<2x32xf32>
    %155 = vector.extract_strided_slice %145 {offsets = [0, 32], sizes = [2, 32], strides = [1, 1]} : vector<2x96xf32> to vector<2x32xf32>
    %156 = arith.addf %154, %155 : vector<2x32xf32>
    %157 = arith.negf %156 : vector<2x32xf32>
    %158 = math.exp %157 : vector<2x32xf32>
    %cst_43 = arith.constant 1.000000e+00 : f32
    %159 = vector.broadcast %cst_43 : f32 to vector<2x32xf32>
    %160 = arith.addf %159, %158 : vector<2x32xf32>
    %161 = arith.divf %159, %160 : vector<2x32xf32>
    %162 = vector.extract_strided_slice %144 {offsets = [0, 64], sizes = [2, 32], strides = [1, 1]} : vector<2x96xf32> to vector<2x32xf32>
    %163 = vector.extract_strided_slice %145 {offsets = [0, 64], sizes = [2, 32], strides = [1, 1]} : vector<2x96xf32> to vector<2x32xf32>
    %164 = vector.broadcast %7 : vector<1x32xf32> to vector<2x32xf32>
    %165 = arith.addf %163, %164 : vector<2x32xf32>
    %166 = arith.mulf %153, %165 : vector<2x32xf32>
    %167 = arith.addf %162, %166 : vector<2x32xf32>
    %168 = math.tanh %167 : vector<2x32xf32>
    %cst_44 = arith.constant 1.000000e+00 : f32
    %169 = vector.broadcast %cst_44 : f32 to vector<2x32xf32>
    %170 = arith.subf %169, %161 : vector<2x32xf32>
    %171 = arith.mulf %170, %168 : vector<2x32xf32>
    %172 = arith.mulf %161, %136 : vector<2x32xf32>
    %173 = arith.addf %171, %172 : vector<2x32xf32>
    %174 = vector.broadcast %142 : i32 to vector<2x1xi32>
    %175 = arith.cmpi slt, %174, %3 : vector<2x1xi32>
    %176 = vector.shape_cast %175 : vector<2x1xi1> to vector<2x1xi1>
    %177 = vector.broadcast %176 : vector<2x1xi1> to vector<2x32xi1>
    %178 = arith.select %177, %173, %136 : vector<2x32xi1>, vector<2x32xf32>
    %cst_45 = arith.constant 0.000000e+00 : f32
    %179 = vector.broadcast %cst_45 : f32 to vector<2x32xf32>
    %180 = vector.shape_cast %175 : vector<2x1xi1> to vector<2x1xi1>
    %181 = vector.broadcast %180 : vector<2x1xi1> to vector<2x32xi1>
    %182 = arith.select %181, %173, %179 : vector<2x32xi1>, vector<2x32xf32>
    %c4_i32 = arith.constant 4 : i32
    %183 = arith.muli %13, %c4_i32 : i32
    %184 = arith.addi %11, %183 : i32
    %c0_46 = arith.constant 0 : index
    %c4 = arith.constant 4 : index
    %c0_47 = arith.constant 0 : index
    %c0_48 = arith.constant 0 : index
    %185 = vector.load %arg3[%c0_46, %c4, %c0_47, %c0_48] : memref<1x8x2x96xf32, #tpu.memory_space<vmem>>, vector<1x1x2x96xf32>
    %186 = vector.shape_cast %185 : vector<1x1x2x96xf32> to vector<2x96xf32>
    %cst_49 = arith.constant dense<0.000000e+00> : vector<2x96xf32>
    %187 = tpu.matmul %178, %5, %cst_49 {dimension_numbers = #tpu.dot_dimension_numbers<[1], [0], [0], [1], [0, 0, 1, 1], [], []>} : vector<2x32xf32>, vector<32x96xf32>, vector<2x96xf32> -> vector<2x96xf32>
    %188 = vector.extract_strided_slice %186 {offsets = [0, 0], sizes = [2, 32], strides = [1, 1]} : vector<2x96xf32> to vector<2x32xf32>
    %189 = vector.extract_strided_slice %187 {offsets = [0, 0], sizes = [2, 32], strides = [1, 1]} : vector<2x96xf32> to vector<2x32xf32>
    %190 = arith.addf %188, %189 : vector<2x32xf32>
    %191 = arith.negf %190 : vector<2x32xf32>
    %192 = math.exp %191 : vector<2x32xf32>
    %cst_50 = arith.constant 1.000000e+00 : f32
    %193 = vector.broadcast %cst_50 : f32 to vector<2x32xf32>
    %194 = arith.addf %193, %192 : vector<2x32xf32>
    %195 = arith.divf %193, %194 : vector<2x32xf32>
    %196 = vector.extract_strided_slice %186 {offsets = [0, 32], sizes = [2, 32], strides = [1, 1]} : vector<2x96xf32> to vector<2x32xf32>
    %197 = vector.extract_strided_slice %187 {offsets = [0, 32], sizes = [2, 32], strides = [1, 1]} : vector<2x96xf32> to vector<2x32xf32>
    %198 = arith.addf %196, %197 : vector<2x32xf32>
    %199 = arith.negf %198 : vector<2x32xf32>
    %200 = math.exp %199 : vector<2x32xf32>
    %cst_51 = arith.constant 1.000000e+00 : f32
    %201 = vector.broadcast %cst_51 : f32 to vector<2x32xf32>
    %202 = arith.addf %201, %200 : vector<2x32xf32>
    %203 = arith.divf %201, %202 : vector<2x32xf32>
    %204 = vector.extract_strided_slice %186 {offsets = [0, 64], sizes = [2, 32], strides = [1, 1]} : vector<2x96xf32> to vector<2x32xf32>
    %205 = vector.extract_strided_slice %187 {offsets = [0, 64], sizes = [2, 32], strides = [1, 1]} : vector<2x96xf32> to vector<2x32xf32>
    %206 = vector.broadcast %7 : vector<1x32xf32> to vector<2x32xf32>
    %207 = arith.addf %205, %206 : vector<2x32xf32>
    %208 = arith.mulf %195, %207 : vector<2x32xf32>
    %209 = arith.addf %204, %208 : vector<2x32xf32>
    %210 = math.tanh %209 : vector<2x32xf32>
    %cst_52 = arith.constant 1.000000e+00 : f32
    %211 = vector.broadcast %cst_52 : f32 to vector<2x32xf32>
    %212 = arith.subf %211, %203 : vector<2x32xf32>
    %213 = arith.mulf %212, %210 : vector<2x32xf32>
    %214 = arith.mulf %203, %178 : vector<2x32xf32>
    %215 = arith.addf %213, %214 : vector<2x32xf32>
    %216 = vector.broadcast %184 : i32 to vector<2x1xi32>
    %217 = arith.cmpi slt, %216, %3 : vector<2x1xi32>
    %218 = vector.shape_cast %217 : vector<2x1xi1> to vector<2x1xi1>
    %219 = vector.broadcast %218 : vector<2x1xi1> to vector<2x32xi1>
    %220 = arith.select %219, %215, %178 : vector<2x32xi1>, vector<2x32xf32>
    %cst_53 = arith.constant 0.000000e+00 : f32
    %221 = vector.broadcast %cst_53 : f32 to vector<2x32xf32>
    %222 = vector.shape_cast %217 : vector<2x1xi1> to vector<2x1xi1>
    %223 = vector.broadcast %222 : vector<2x1xi1> to vector<2x32xi1>
    %224 = arith.select %223, %215, %221 : vector<2x32xi1>, vector<2x32xf32>
    %c5_i32 = arith.constant 5 : i32
    %225 = arith.muli %13, %c5_i32 : i32
    %226 = arith.addi %11, %225 : i32
    %c0_54 = arith.constant 0 : index
    %c5 = arith.constant 5 : index
    %c0_55 = arith.constant 0 : index
    %c0_56 = arith.constant 0 : index
    %227 = vector.load %arg3[%c0_54, %c5, %c0_55, %c0_56] : memref<1x8x2x96xf32, #tpu.memory_space<vmem>>, vector<1x1x2x96xf32>
    %228 = vector.shape_cast %227 : vector<1x1x2x96xf32> to vector<2x96xf32>
    %cst_57 = arith.constant dense<0.000000e+00> : vector<2x96xf32>
    %229 = tpu.matmul %220, %5, %cst_57 {dimension_numbers = #tpu.dot_dimension_numbers<[1], [0], [0], [1], [0, 0, 1, 1], [], []>} : vector<2x32xf32>, vector<32x96xf32>, vector<2x96xf32> -> vector<2x96xf32>
    %230 = vector.extract_strided_slice %228 {offsets = [0, 0], sizes = [2, 32], strides = [1, 1]} : vector<2x96xf32> to vector<2x32xf32>
    %231 = vector.extract_strided_slice %229 {offsets = [0, 0], sizes = [2, 32], strides = [1, 1]} : vector<2x96xf32> to vector<2x32xf32>
    %232 = arith.addf %230, %231 : vector<2x32xf32>
    %233 = arith.negf %232 : vector<2x32xf32>
    %234 = math.exp %233 : vector<2x32xf32>
    %cst_58 = arith.constant 1.000000e+00 : f32
    %235 = vector.broadcast %cst_58 : f32 to vector<2x32xf32>
    %236 = arith.addf %235, %234 : vector<2x32xf32>
    %237 = arith.divf %235, %236 : vector<2x32xf32>
    %238 = vector.extract_strided_slice %228 {offsets = [0, 32], sizes = [2, 32], strides = [1, 1]} : vector<2x96xf32> to vector<2x32xf32>
    %239 = vector.extract_strided_slice %229 {offsets = [0, 32], sizes = [2, 32], strides = [1, 1]} : vector<2x96xf32> to vector<2x32xf32>
    %240 = arith.addf %238, %239 : vector<2x32xf32>
    %241 = arith.negf %240 : vector<2x32xf32>
    %242 = math.exp %241 : vector<2x32xf32>
    %cst_59 = arith.constant 1.000000e+00 : f32
    %243 = vector.broadcast %cst_59 : f32 to vector<2x32xf32>
    %244 = arith.addf %243, %242 : vector<2x32xf32>
    %245 = arith.divf %243, %244 : vector<2x32xf32>
    %246 = vector.extract_strided_slice %228 {offsets = [0, 64], sizes = [2, 32], strides = [1, 1]} : vector<2x96xf32> to vector<2x32xf32>
    %247 = vector.extract_strided_slice %229 {offsets = [0, 64], sizes = [2, 32], strides = [1, 1]} : vector<2x96xf32> to vector<2x32xf32>
    %248 = vector.broadcast %7 : vector<1x32xf32> to vector<2x32xf32>
    %249 = arith.addf %247, %248 : vector<2x32xf32>
    %250 = arith.mulf %237, %249 : vector<2x32xf32>
    %251 = arith.addf %246, %250 : vector<2x32xf32>
    %252 = math.tanh %251 : vector<2x32xf32>
    %cst_60 = arith.constant 1.000000e+00 : f32
    %253 = vector.broadcast %cst_60 : f32 to vector<2x32xf32>
    %254 = arith.subf %253, %245 : vector<2x32xf32>
    %255 = arith.mulf %254, %252 : vector<2x32xf32>
    %256 = arith.mulf %245, %220 : vector<2x32xf32>
    %257 = arith.addf %255, %256 : vector<2x32xf32>
    %258 = vector.broadcast %226 : i32 to vector<2x1xi32>
    %259 = arith.cmpi slt, %258, %3 : vector<2x1xi32>
    %260 = vector.shape_cast %259 : vector<2x1xi1> to vector<2x1xi1>
    %261 = vector.broadcast %260 : vector<2x1xi1> to vector<2x32xi1>
    %262 = arith.select %261, %257, %220 : vector<2x32xi1>, vector<2x32xf32>
    %cst_61 = arith.constant 0.000000e+00 : f32
    %263 = vector.broadcast %cst_61 : f32 to vector<2x32xf32>
    %264 = vector.shape_cast %259 : vector<2x1xi1> to vector<2x1xi1>
    %265 = vector.broadcast %264 : vector<2x1xi1> to vector<2x32xi1>
    %266 = arith.select %265, %257, %263 : vector<2x32xi1>, vector<2x32xf32>
    %c6_i32 = arith.constant 6 : i32
    %267 = arith.muli %13, %c6_i32 : i32
    %268 = arith.addi %11, %267 : i32
    %c0_62 = arith.constant 0 : index
    %c6 = arith.constant 6 : index
    %c0_63 = arith.constant 0 : index
    %c0_64 = arith.constant 0 : index
    %269 = vector.load %arg3[%c0_62, %c6, %c0_63, %c0_64] : memref<1x8x2x96xf32, #tpu.memory_space<vmem>>, vector<1x1x2x96xf32>
    %270 = vector.shape_cast %269 : vector<1x1x2x96xf32> to vector<2x96xf32>
    %cst_65 = arith.constant dense<0.000000e+00> : vector<2x96xf32>
    %271 = tpu.matmul %262, %5, %cst_65 {dimension_numbers = #tpu.dot_dimension_numbers<[1], [0], [0], [1], [0, 0, 1, 1], [], []>} : vector<2x32xf32>, vector<32x96xf32>, vector<2x96xf32> -> vector<2x96xf32>
    %272 = vector.extract_strided_slice %270 {offsets = [0, 0], sizes = [2, 32], strides = [1, 1]} : vector<2x96xf32> to vector<2x32xf32>
    %273 = vector.extract_strided_slice %271 {offsets = [0, 0], sizes = [2, 32], strides = [1, 1]} : vector<2x96xf32> to vector<2x32xf32>
    %274 = arith.addf %272, %273 : vector<2x32xf32>
    %275 = arith.negf %274 : vector<2x32xf32>
    %276 = math.exp %275 : vector<2x32xf32>
    %cst_66 = arith.constant 1.000000e+00 : f32
    %277 = vector.broadcast %cst_66 : f32 to vector<2x32xf32>
    %278 = arith.addf %277, %276 : vector<2x32xf32>
    %279 = arith.divf %277, %278 : vector<2x32xf32>
    %280 = vector.extract_strided_slice %270 {offsets = [0, 32], sizes = [2, 32], strides = [1, 1]} : vector<2x96xf32> to vector<2x32xf32>
    %281 = vector.extract_strided_slice %271 {offsets = [0, 32], sizes = [2, 32], strides = [1, 1]} : vector<2x96xf32> to vector<2x32xf32>
    %282 = arith.addf %280, %281 : vector<2x32xf32>
    %283 = arith.negf %282 : vector<2x32xf32>
    %284 = math.exp %283 : vector<2x32xf32>
    %cst_67 = arith.constant 1.000000e+00 : f32
    %285 = vector.broadcast %cst_67 : f32 to vector<2x32xf32>
    %286 = arith.addf %285, %284 : vector<2x32xf32>
    %287 = arith.divf %285, %286 : vector<2x32xf32>
    %288 = vector.extract_strided_slice %270 {offsets = [0, 64], sizes = [2, 32], strides = [1, 1]} : vector<2x96xf32> to vector<2x32xf32>
    %289 = vector.extract_strided_slice %271 {offsets = [0, 64], sizes = [2, 32], strides = [1, 1]} : vector<2x96xf32> to vector<2x32xf32>
    %290 = vector.broadcast %7 : vector<1x32xf32> to vector<2x32xf32>
    %291 = arith.addf %289, %290 : vector<2x32xf32>
    %292 = arith.mulf %279, %291 : vector<2x32xf32>
    %293 = arith.addf %288, %292 : vector<2x32xf32>
    %294 = math.tanh %293 : vector<2x32xf32>
    %cst_68 = arith.constant 1.000000e+00 : f32
    %295 = vector.broadcast %cst_68 : f32 to vector<2x32xf32>
    %296 = arith.subf %295, %287 : vector<2x32xf32>
    %297 = arith.mulf %296, %294 : vector<2x32xf32>
    %298 = arith.mulf %287, %262 : vector<2x32xf32>
    %299 = arith.addf %297, %298 : vector<2x32xf32>
    %300 = vector.broadcast %268 : i32 to vector<2x1xi32>
    %301 = arith.cmpi slt, %300, %3 : vector<2x1xi32>
    %302 = vector.shape_cast %301 : vector<2x1xi1> to vector<2x1xi1>
    %303 = vector.broadcast %302 : vector<2x1xi1> to vector<2x32xi1>
    %304 = arith.select %303, %299, %262 : vector<2x32xi1>, vector<2x32xf32>
    %cst_69 = arith.constant 0.000000e+00 : f32
    %305 = vector.broadcast %cst_69 : f32 to vector<2x32xf32>
    %306 = vector.shape_cast %301 : vector<2x1xi1> to vector<2x1xi1>
    %307 = vector.broadcast %306 : vector<2x1xi1> to vector<2x32xi1>
    %308 = arith.select %307, %299, %305 : vector<2x32xi1>, vector<2x32xf32>
    %c7_i32_70 = arith.constant 7 : i32
    %309 = arith.muli %13, %c7_i32_70 : i32
    %310 = arith.addi %11, %309 : i32
    %c0_71 = arith.constant 0 : index
    %c7 = arith.constant 7 : index
    %c0_72 = arith.constant 0 : index
    %c0_73 = arith.constant 0 : index
    %311 = vector.load %arg3[%c0_71, %c7, %c0_72, %c0_73] : memref<1x8x2x96xf32, #tpu.memory_space<vmem>>, vector<1x1x2x96xf32>
    %312 = vector.shape_cast %311 : vector<1x1x2x96xf32> to vector<2x96xf32>
    %cst_74 = arith.constant dense<0.000000e+00> : vector<2x96xf32>
    %313 = tpu.matmul %304, %5, %cst_74 {dimension_numbers = #tpu.dot_dimension_numbers<[1], [0], [0], [1], [0, 0, 1, 1], [], []>} : vector<2x32xf32>, vector<32x96xf32>, vector<2x96xf32> -> vector<2x96xf32>
    %314 = vector.extract_strided_slice %312 {offsets = [0, 0], sizes = [2, 32], strides = [1, 1]} : vector<2x96xf32> to vector<2x32xf32>
    %315 = vector.extract_strided_slice %313 {offsets = [0, 0], sizes = [2, 32], strides = [1, 1]} : vector<2x96xf32> to vector<2x32xf32>
    %316 = arith.addf %314, %315 : vector<2x32xf32>
    %317 = arith.negf %316 : vector<2x32xf32>
    %318 = math.exp %317 : vector<2x32xf32>
    %cst_75 = arith.constant 1.000000e+00 : f32
    %319 = vector.broadcast %cst_75 : f32 to vector<2x32xf32>
    %320 = arith.addf %319, %318 : vector<2x32xf32>
    %321 = arith.divf %319, %320 : vector<2x32xf32>
    %322 = vector.extract_strided_slice %312 {offsets = [0, 32], sizes = [2, 32], strides = [1, 1]} : vector<2x96xf32> to vector<2x32xf32>
    %323 = vector.extract_strided_slice %313 {offsets = [0, 32], sizes = [2, 32], strides = [1, 1]} : vector<2x96xf32> to vector<2x32xf32>
    %324 = arith.addf %322, %323 : vector<2x32xf32>
    %325 = arith.negf %324 : vector<2x32xf32>
    %326 = math.exp %325 : vector<2x32xf32>
    %cst_76 = arith.constant 1.000000e+00 : f32
    %327 = vector.broadcast %cst_76 : f32 to vector<2x32xf32>
    %328 = arith.addf %327, %326 : vector<2x32xf32>
    %329 = arith.divf %327, %328 : vector<2x32xf32>
    %330 = vector.extract_strided_slice %312 {offsets = [0, 64], sizes = [2, 32], strides = [1, 1]} : vector<2x96xf32> to vector<2x32xf32>
    %331 = vector.extract_strided_slice %313 {offsets = [0, 64], sizes = [2, 32], strides = [1, 1]} : vector<2x96xf32> to vector<2x32xf32>
    %332 = vector.broadcast %7 : vector<1x32xf32> to vector<2x32xf32>
    %333 = arith.addf %331, %332 : vector<2x32xf32>
    %334 = arith.mulf %321, %333 : vector<2x32xf32>
    %335 = arith.addf %330, %334 : vector<2x32xf32>
    %336 = math.tanh %335 : vector<2x32xf32>
    %cst_77 = arith.constant 1.000000e+00 : f32
    %337 = vector.broadcast %cst_77 : f32 to vector<2x32xf32>
    %338 = arith.subf %337, %329 : vector<2x32xf32>
    %339 = arith.mulf %338, %336 : vector<2x32xf32>
    %340 = arith.mulf %329, %304 : vector<2x32xf32>
    %341 = arith.addf %339, %340 : vector<2x32xf32>
    %342 = vector.broadcast %310 : i32 to vector<2x1xi32>
    %343 = arith.cmpi slt, %342, %3 : vector<2x1xi32>
    %344 = vector.shape_cast %343 : vector<2x1xi1> to vector<2x1xi1>
    %345 = vector.broadcast %344 : vector<2x1xi1> to vector<2x32xi1>
    %346 = arith.select %345, %341, %304 : vector<2x32xi1>, vector<2x32xf32>
    %cst_78 = arith.constant 0.000000e+00 : f32
    %347 = vector.broadcast %cst_78 : f32 to vector<2x32xf32>
    %348 = vector.shape_cast %343 : vector<2x1xi1> to vector<2x1xi1>
    %349 = vector.broadcast %348 : vector<2x1xi1> to vector<2x32xi1>
    %350 = arith.select %349, %341, %347 : vector<2x32xi1>, vector<2x32xf32>
    %c0_79 = arith.constant 0 : index
    %c0_80 = arith.constant 0 : index
    %351 = vector.load %arg8[%c0_79, %c0_80] : memref<2x32xf32, #tpu.memory_space<vmem>>, vector<2x32xf32>
    tpu.vector_store %arg8[%c0_79, %c0_80], %346 {strides = array<i32>} : memref<2x32xf32, #tpu.memory_space<vmem>>, vector<2x32xf32>,
    %352 = tpu.concatenate %56, %98, %140, %182, %224, %266, %308, %350 in 1 : vector<2x32xf32>, vector<2x32xf32>, vector<2x32xf32>, vector<2x32xf32>, vector<2x32xf32>, vector<2x32xf32>, vector<2x32xf32>, vector<2x32xf32> -> vector<2x256xf32>
    %c0_81 = arith.constant 0 : index
    %c0_82 = arith.constant 0 : index
    %c0_83 = arith.constant 0 : index
    %c0_84 = arith.constant 0 : index
    %353 = vector.load %arg6[%c0_81, %c0_82, %c0_83, %c0_84] : memref<1x1x2x256xf32, #tpu.memory_space<vmem>>, vector<1x1x2x256xf32>
    %354 = vector.shape_cast %353 : vector<1x1x2x256xf32> to vector<2x256xf32>
    %355 = vector.shape_cast %352 : vector<2x256xf32> to vector<1x1x2x256xf32>
    tpu.vector_store %arg6[%c0_81, %c0_82, %c0_83, %c0_84], %355 {strides = array<i32>} : memref<1x1x2x256xf32, #tpu.memory_space<vmem>>, vector<1x1x2x256xf32>,
    %c0_i32_85 = arith.constant 0 : i32
    %356 = arith.cmpi eq, %arg1, %c0_i32_85 : i32
    %357 = arith.extui %356 : i1 to i32
    %c0_i32_86 = arith.constant 0 : i32
    %358 = arith.cmpi ne, %357, %c0_i32_86 : i32
    scf.if %358 {
      %c0_87 = arith.constant 0 : index
      %c0_88 = arith.constant 0 : index
      %c0_89 = arith.constant 0 : index
      %359 = vector.load %arg7[%c0_87, %c0_88, %c0_89] : memref<1x2x32xf32, #tpu.memory_space<vmem>>, vector<1x2x32xf32>
      %360 = vector.shape_cast %359 : vector<1x2x32xf32> to vector<2x32xf32>
      %361 = vector.shape_cast %346 : vector<2x32xf32> to vector<1x2x32xf32>
      tpu.vector_store %arg7[%c0_87, %c0_88, %c0_89], %361 {strides = array<i32>} : memref<1x2x32xf32, #tpu.memory_space<vmem>>, vector<1x2x32xf32>,
    } else {
    }
    return
  }
  func.func @transform_0(%arg0: i32, %arg1: i32) -> (i32, i32) {
    %c0_i32 = arith.constant 0 : i32
    %c0_i32_0 = arith.constant 0 : i32
    %c0_i32_1 = arith.constant 0 : i32
    return %c0_i32, %c0_i32_0 : i32, i32
  }
  func.func @transform_1(%arg0: i32, %arg1: i32) -> (i32, i32, i32, i32) {
    %c0_i32 = arith.constant 0 : i32
    %c0_i32_0 = arith.constant 0 : i32
    %c0_i32_1 = arith.constant 0 : i32
    return %arg0, %arg1, %c0_i32, %c0_i32_0 : i32, i32, i32, i32
  }
  func.func @transform_2(%arg0: i32, %arg1: i32) -> (i32, i32, i32) {
    %c0_i32 = arith.constant 0 : i32
    %c0_i32_0 = arith.constant 0 : i32
    %c0_i32_1 = arith.constant 0 : i32
    return %arg0, %c0_i32, %c0_i32_0 : i32, i32, i32
  }
  func.func @transform_3(%arg0: i32, %arg1: i32) -> (i32, i32, i32) {
    %c0_i32 = arith.constant 0 : i32
    %c0_i32_0 = arith.constant 0 : i32
    %c0_i32_1 = arith.constant 0 : i32
    return %arg0, %c0_i32, %c0_i32_0 : i32, i32, i32
  }
  func.func @transform_4(%arg0: i32, %arg1: i32) -> (i32, i32, i32, i32) {
    %c0_i32 = arith.constant 0 : i32
    %c0_i32_0 = arith.constant 0 : i32
    %c0_i32_1 = arith.constant 0 : i32
    return %arg0, %arg1, %c0_i32, %c0_i32_0 : i32, i32, i32, i32
  }
  func.func @transform_5(%arg0: i32, %arg1: i32) -> (i32, i32, i32) {
    %c0_i32 = arith.constant 0 : i32
    %c0_i32_0 = arith.constant 0 : i32
    %c0_i32_1 = arith.constant 0 : i32
    return %arg0, %c0_i32, %c0_i32_0 : i32, i32, i32
  }
}

</mosaic_0001>

<bundles_post_ra>
// kernel: encoder_forward.1
= control target key start
LH: loop header
LB: loop body
LE: loop exit
PB: predicated region body
PF: predicated region fallthrough
CT: control target
= control target key end

     0   :  { %s1325_s18 = smov 0   ;;  %s1327_s19 = smov 0   ;;  %s1517_s0 = inlined_call_operand.vmem [shape: s32[2,1], index: 0, kind: input, shape index: {}]   ;;  %s1518_s1 = inlined_call_operand.vmem [shape: f32[2,8,2,96], index: 1, kind: input, shape index: {}]   ;;  %s1519_s2 = inlined_call_operand.vmem [shape: f32[2,32,96], index: 2, kind: input, shape index: {}]   ;;  %s1520_s3 = inlined_call_operand.vmem [shape: f32[2,1,32], index: 3, kind: input, shape index: {}]   ;;  %s1521_s4 = inlined_call_operand.vmem [shape: f32[2,1,2,256], index: 4, kind: output, shape index: {0}]   ;;  %s1522_s5 = inlined_call_operand.vmem [shape: f32[2,2,32], index: 5, kind: output, shape index: {1}]  }
   0x1   :  { %s1329_s20 = smov 0  }
   0x2 LB: > { %s28_s21 = sadd.s32 1, %s1284_s19  ;;  %p1147_p0 = scmp.ge.s32.totalorder %s1288_s20, 1  ;;  %s1288_s20 = sphi %s1329_s20, %s16_s20   ;;  %s1284_s19 = sphi %s1327_s19, %s1524_s19   ;;  %s1280_s18 = sphi %s1325_s18, %s1523_s18  }
   0x3   : > { %p30_p1 = scmp.ge.s32.totalorder %s28_s21, 2  ;;  %p229_p2 = scmp.lt.s32.totalorder %s1288_s20, 3 }
   0x5   : > { %s1526_s21 = smov (%p30_p1, %s28_s21), 0  ;;  %p230_p3 = pnand %p1147_p0, %p229_p2 }
   0x6   : > { %p278_p4 = scmp.lt.s32.totalorder (!%p230_p3), %s1280_s18, 1  ;;  %s1291_s30 = smov (!%p230_p3), 64  }
   0x7   : > { %233 = sbr.rel (%p230_p3) target bundleno = 4650 (0x122a), region = 36  ;;  %s1292_s6 = smov (!%p230_p3), 32  }
   0x8   : > { %p321_p5 = scmp.eq.s32.totalorder (!%p230_p3), %s1280_s18, 0  ;;  %s1294_s14 = smov (!%p230_p3), 96  }
   0xc   : > { %vm312_vm0 = vcmask 254976   ;;  %v1290_v0 = vmov 0.0   ;;  %s1348_s22 = scalar_select %p278_p4, %s1280_s18, 1  ;;  %vm327_vm1 = vcmask 261120   ;;  %v1381_v27 = vld [vmem:[%s1517_s0] sm:$0x3] }
   0xd   : > { %313 = vst.msk [vmem:[#allocation2] sm:$0x3] %vm312_vm0, %v1290_v0  ;;  %s1376_s11 = scalar_select %p321_p5, 0, 7  ;;  %v1293_v29 = vmov 0  }
   0xe   : > { %s1183_s23 = sshll.u32 %s1348_s22, 5  ;;  %s294_s26 = scalar_lea.vmem %s1520_s3, %s1348_s22  ;;  %1214 = vset.pattern.permute.xlu2 %v1293_v29  ;;  %1215 = vset.pattern.permute.xlu1 %v1293_v29 }
   0xf   : > { %s291_s29 = scalar_lea.vmem %s1519_s2, %s1183_s23  ;;  %v1217_v1 = vld [vmem:[%s294_s26] ss:$0 sm:$0xff]  ;;  %s1182_s7 = sshll.u32 %s1348_s22, 4  ;;  %v399_v28 = vstv %s1376_s11  ;;  %1216 = vset.pattern.permute.xlu0 %v1293_v29 }
  0x10   : > { %v318_v2 = vld [vmem:[%s291_s29 + $0x18] sm:$0xff]  ;;  %v317_v3 = vld [vmem:[%s291_s29 + $0x10] sm:$0xff]  ;;  %373 = vrot.lane.b32.xlu0 %v1217_v1, %s1291_s30  ;;  %v316_v4 = vld [vmem:[%s291_s29 + $0x8] sm:$0xff]  ;;  %s1369_s10 = scalar_lea.vmem %s1518_s1, %s1182_s7  ;;  %vm400_vm6 = vcmp.lt.s32.totalorder %v399_v28, %v1381_v27  ;;  %s1154_s12 = sshll.u32 %s1348_s22, 1 }
  0x11   : > { %343 = vmatpush.msra.mxu0 %v318_v2  ;;  %428 = vmatpush.msra.mxu1 %v318_v2  ;;  %v315_v6 = vld [vmem:[%s291_s29] sm:$0xff]  ;;  %v401_v30 = vsel %vm400_vm6, 1, %v1293_v29  ;;  %s1400_s15 = scalar_select %p321_p5, 1, 4294967295 }
  0x12   : > { %506 = vmatpush.msra.mxu2 %v318_v2  ;;  %584 = vmatpush.msra.mxu3 %v318_v2  ;;  %v326_v10 = vld [vmem:[%s1369_s10] sm:$0x3]  ;;  %v1157_v46 = vld [vmem:[%s1369_s10 + $0x2] sm:$0x3] }
  0x13   : > { %344 = vmatpush.msra.mxu0 %v317_v3  ;;  %429 = vmatpush.msra.mxu1 %v317_v3  ;;  %s408_s16 = sadd.s32 %s1400_s15, %s1376_s11  ;;  %s1160_s17 = sshll.u32 %s1400_s15, 1 }
  0x14   : > { %v325_v5 = vld [vmem:[#allocation2] sm:$0x3]  ;;  %507 = vmatpush.msra.mxu2 %v317_v3  ;;  %585 = vmatpush.msra.mxu3 %v317_v3  ;;  %v476_v63 = vstv %s408_s16  ;;  %s563_s18 = smul.u32 3, %s1400_s15  ;;  %s486_s23 = sadd.s32 %s1160_s17, %s1376_s11 }
  0x15   : > { %394 = vrot.lane.b32.xlu2 %v325_v5, %s1292_s6  ;;  %345 = vmatpush.msra.mxu0 %v316_v4  ;;  %vm477_vm12 = vcmp.lt.s32.totalorder %v476_v63, %v1381_v27  ;;  %s1167_s25 = sshll.u32 %s1400_s15, 2  ;;  %s719_s27 = smul.u32 5, %s1400_s15 }
  0x16   : > { %430 = vmatpush.msra.mxu1 %v316_v4  ;;  %508 = vmatpush.msra.mxu2 %v316_v4  ;;  %v478_v0 = vsel %vm477_vm12, 1, %v1293_v29  ;;  %s564_s24 = sadd.s32 %s563_s18, %s1376_s11  ;;  %s642_s26 = sadd.s32 %s1167_s25, %s1376_s11 }
  0x17   : > { %346 = vmatpush.msra.mxu0 %v315_v6  ;;  %586 = vmatpush.msra.mxu3 %v316_v4  ;;  %s720_s28 = sadd.s32 %s719_s27, %s1376_s11  ;;  %s797_s29 = smul.u32 6, %s1400_s15 }
  0x18   : > { %1155 = vmatmul.msk.f32.vlgmr.msra.gmra.mxu0 %vm327_vm1, %v325_v5  ;;  %431 = vmatpush.msra.mxu1 %v315_v6  ;;  %s875_s8 = smul.u32 7, %s1400_s15  ;;  %s307_s15 = scalar_lea.vmem %s1522_s5, %s1154_s12 }
  0x19   : > { %509 = vmatpush.msra.mxu2 %v315_v6  ;;  %662 = vmatpush.msrb.mxu0 %v318_v2  ;;  %s798_s7 = sadd.s32 %s797_s29, %s1376_s11 }
  0x1a   : > { %740 = vmatpush.msrb.mxu1 %v318_v2  ;;  %587 = vmatpush.msra.mxu3 %v315_v6  ;;  %s876_s9 = sadd.s32 %s875_s8, %s1376_s11 }
  0x1b   : > { %818 = vmatpush.msrb.mxu2 %v318_v2  ;;  %663 = vmatpush.msrb.mxu0 %v317_v3 }
  0x1c   : > { %741 = vmatpush.msrb.mxu1 %v317_v3  ;;  %896 = vmatpush.msrb.mxu3 %v318_v2 }
  0x1d   : > { %819 = vmatpush.msrb.mxu2 %v317_v3  ;;  %664 = vmatpush.msrb.mxu0 %v316_v4 }
  0x1e   : > { %742 = vmatpush.msrb.mxu1 %v316_v4  ;;  %897 = vmatpush.msrb.mxu3 %v317_v3 }
  0x1f   : > { %820 = vmatpush.msrb.mxu2 %v316_v4  ;;  %665 = vmatpush.msrb.mxu0 %v315_v6 }
  0x20   : > { %743 = vmatpush.msrb.mxu1 %v315_v6  ;;  %898 = vmatpush.msrb.mxu3 %v316_v4 }
  0x21   : > { %821 = vmatpush.msrb.mxu2 %v315_v6  ;;  %403 = vperm.xlu2 %1214, %v401_v30  }
  0x22   : > { %899 = vmatpush.msrb.mxu3 %v315_v6 }
  0x6f   : > { %v395_v34 = vpop.permute.xlu2 %394 }
  0x7b   : > { %v404_v36 = vpop.permute.xlu2 %403 }
  0x7c   : > { %vm405_vm7 = vcmp.eq.s32.totalorder %v404_v36, 1 }
  0x82   : > { %v1361_v7 = vpop.permute.xlu0 %373 }
  0x95   : > { %v348_v8 = vpop.f32.mrf.mxu0 }
  0x96   : > { %v376_v9 = vadd.f32 %v1361_v7, %v348_v8  ;;  %v351_v11 = vadd.f32 %v348_v8, %v326_v10 }
  0x98   : > { %378 = vrot.lane.b32.xlu0 %v376_v9, %s1291_s30  ;;  %v1156_v12 = vmul.f32 -1.442695, %v351_v11 }
  0x9a   : > { %1218 = vpow2.f32 %v1156_v12 }
  0xa0   : > { %v1219_v13 = vpop.eup %1218 }
  0xa1   : > { %v355_v14 = vadd.f32 1.0, %v1219_v13 }
  0xa3   : > { %1220 = vrcp.f32 %v355_v14  ;;  %v367_v20 = vand.u32 2147483648, %v355_v14  ;;  %vm361_vm3 = vweird.f32 %v355_v14  ;;  %v365_v21 = vand.u32 2147483647, %v355_v14 }
  0xa5   : > { %v368_v23 = vor.u32 1.1754944e-38, %v367_v20  ;;  %vm366_vm5 = vcmp.eq.f32.partialorder %v365_v21, 8.507059e+37  ;;  %v554_v21 = vstv %s486_s23 }
  0xa6   : > { %vm555_vm14 = vcmp.lt.s32.totalorder %v554_v21, %v1381_v27 }
  0xa9   : > { %v1221_v15 = vpop.eup %1220 }
  0xaa   : > { %v357_v16 = vmul.f32 %v1221_v15, %v355_v14  ;;  %vm362_vm2 = vweird.f32 %v1221_v15 }
  0xab   : > { %vm363_vm4 = vmor %vm361_vm3, %vm362_vm2 }
  0xac   : > { %v358_v17 = vsub.f32 1.0, %v357_v16  ;;  %v1161_v16 = vld [vmem:[%s1369_s10 + $0x4] sm:$0x3] }
  0xae   : > { %v359_v18 = vmul.f32 %v1221_v15, %v358_v17 }
  0xb0   : > { %v360_v19 = vadd.f32 %v1221_v15, %v359_v18 }
  0xb2   : > { %v364_v22 = vsel %vm363_vm4, %v1221_v15, %v360_v19 }
  0xb3   : > { %v369_v24 = vsel %vm366_vm5, %v368_v23, %v364_v22  ;;  %v556_v22 = vsel %vm555_vm14, 1, %v1293_v29  ;;  %v632_v23 = vstv %s564_s24 }
  0xb4   : > { %v388_v35 = vsub.f32 1.0, %v369_v24  ;;  %v397_v38 = vmul.f32 %v395_v34, %v369_v24  ;;  %vm633_vm15 = vcmp.lt.s32.totalorder %v632_v23, %v1381_v27  ;;  %v710_v23 = vstv %s642_s26 }
  0xb5   : > { %vm711_vm12 = vcmp.lt.s32.totalorder %v710_v23, %v1381_v27 }
 0x10a   : > { %v379_v25 = vpop.permute.xlu0 %378 }
 0x10b   : > { %v381_v26 = vmul.f32 %v379_v25, %v369_v24  ;;  %v634_v25 = vsel %vm633_vm15, 1, %v1293_v29 }
 0x10d   : > { %383 = vrot.lane.b32.xlu1 %v381_v26, %s1291_s30 }
 0x17f   : > { %v384_v31 = vpop.permute.xlu1 %383 }
 0x180   : > { %v386_v32 = vadd.f32 %v384_v31, %v326_v10 }
 0x182   : > { %1222 = vtanh.f32 %v386_v32 }
 0x188   : > { %v1223_v33 = vpop.eup %1222 }
 0x189   : > { %390 = vrot.lane.b32.xlu1 %v1223_v33, %s1294_s14 }
 0x1fb   : > { %v391_v37 = vpop.permute.xlu1 %390 }
 0x1fc   : > { %v393_v39 = vmul.f32 %v391_v37, %v388_v35 }
 0x1fe   : > { %v398_v40 = vadd.f32 %v397_v38, %v393_v39 }
 0x200   : > { %v1390_v41 = vsel %vm405_vm7, %v398_v40, 0.0  ;;  %v406_v42 = vsel %vm405_vm7, %v398_v40, %v395_v34 }
 0x201   : > { %412 = vrot.lane.b32.xlu0 %v406_v42, %s1294_s14 }
 0x273   : > { %v413_v43 = vpop.permute.xlu0 %412 }
 0x274   : > { %1158 = vmatmul.msk.f32.vlgmr.msra.gmra.mxu1 %vm327_vm1, %v413_v43 }
 0x2f1   : > { %v433_v44 = vpop.f32.mrf.mxu1 }
 0x2f2   : > { %v456_v45 = vadd.f32 %v433_v44, %v1361_v7  ;;  %v436_v47 = vadd.f32 %v1157_v46, %v433_v44 }
 0x2f4   : > { %458 = vrot.lane.b32.xlu1 %v456_v45, %s1291_s30  ;;  %v1159_v48 = vmul.f32 -1.442695, %v436_v47 }
 0x2f6   : > { %1224 = vpow2.f32 %v1159_v48 }
 0x2fc   : > { %v1225_v49 = vpop.eup %1224  ;;  %480 = vperm.xlu1 %1215, %v478_v0  }
 0x2fd   : > { %v440_v50 = vadd.f32 1.0, %v1225_v49 }
 0x2ff   : > { %1226 = vrcp.f32 %v440_v50  ;;  %v452_v56 = vand.u32 2147483648, %v440_v50  ;;  %vm446_vm9 = vweird.f32 %v440_v50  ;;  %v450_v57 = vand.u32 2147483647, %v440_v50 }
 0x301   : > { %v453_v59 = vor.u32 1.1754944e-38, %v452_v56  ;;  %vm451_vm11 = vcmp.eq.f32.partialorder %v450_v57, 8.507059e+37 }
 0x305   : > { %v1227_v51 = vpop.eup %1226 }
 0x306   : > { %v442_v52 = vmul.f32 %v1227_v51, %v440_v50  ;;  %vm447_vm8 = vweird.f32 %v1227_v51 }
 0x307   : > { %vm448_vm10 = vmor %vm446_vm9, %vm447_vm8 }
 0x308   : > { %v443_v53 = vsub.f32 1.0, %v442_v52 }
 0x30a   : > { %v444_v54 = vmul.f32 %v1227_v51, %v443_v53 }
 0x30c   : > { %v445_v55 = vadd.f32 %v1227_v51, %v444_v54  ;;  %v1164_v54 = vld [vmem:[%s1369_s10 + $0x6] sm:$0x3] }
 0x30e   : > { %v449_v58 = vsel %vm448_vm10, %v1227_v51, %v445_v55 }
 0x30f   : > { %v454_v61 = vsel %vm451_vm11, %v453_v59, %v449_v58 }
 0x310   : > { %v468_v4 = vsub.f32 1.0, %v454_v61  ;;  %v474_v8 = vmul.f32 %v454_v61, %v406_v42 }
 0x366   : > { %v459_v60 = vpop.permute.xlu1 %458 }
 0x367   : > { %v461_v62 = vmul.f32 %v459_v60, %v454_v61 }
 0x369   : > { %463 = vrot.lane.b32.xlu2 %v461_v62, %s1291_s30 }
 0x36e   : > { %v481_v5 = vpop.permute.xlu1 %480 }
 0x36f   : > { %vm482_vm13 = vcmp.eq.s32.totalorder %v481_v5, 1 }
 0x3c3   : > { %v464_v1 = vpop.permute.xlu2 %463 }
 0x3c4   : > { %v466_v2 = vadd.f32 %v1157_v46, %v464_v1 }
 0x3c6   : > { %1228 = vtanh.f32 %v466_v2 }
 0x3cc   : > { %v1229_v3 = vpop.eup %1228 }
 0x3cd   : > { %470 = vrot.lane.b32.xlu0 %v1229_v3, %s1294_s14 }
 0x43f   : > { %v471_v6 = vpop.permute.xlu0 %470 }
 0x440   : > { %v473_v9 = vmul.f32 %v471_v6, %v468_v4 }
 0x442   : > { %v475_v10 = vadd.f32 %v474_v8, %v473_v9 }
 0x444   : > { %v1407_v11 = vsel %vm482_vm13, %v475_v10, 0.0  ;;  %v483_v12 = vsel %vm482_vm13, %v475_v10, %v406_v42 }
 0x445   : > { %490 = vrot.lane.b32.xlu2 %v483_v12, %s1294_s14 }
 0x49f   : > { %v491_v13 = vpop.permute.xlu2 %490 }
 0x4a0   : > { %1162 = vmatmul.msk.f32.vlgmr.msra.gmra.mxu2 %vm327_vm1, %v491_v13 }
 0x523   : > { %v511_v14 = vpop.f32.mrf.mxu2 }
 0x524   : > { %v534_v15 = vadd.f32 %v511_v14, %v1361_v7  ;;  %v514_v17 = vadd.f32 %v1161_v16, %v511_v14 }
 0x526   : > { %536 = vrot.lane.b32.xlu0 %v534_v15, %s1291_s30  ;;  %v1163_v18 = vmul.f32 -1.442695, %v514_v17 }
 0x528   : > { %1230 = vpow2.f32 %v1163_v18 }
 0x52e   : > { %v1231_v19 = vpop.eup %1230  ;;  %558 = vperm.xlu0 %1216, %v556_v22  }
 0x52f   : > { %v518_v20 = vadd.f32 1.0, %v1231_v19 }
 0x531   : > { %1232 = vrcp.f32 %v518_v20  ;;  %v530_v32 = vand.u32 2147483648, %v518_v20  ;;  %vm524_vm3 = vweird.f32 %v518_v20  ;;  %v528_v33 = vand.u32 2147483647, %v518_v20 }
 0x533   : > { %v531_v35 = vor.u32 1.1754944e-38, %v530_v32  ;;  %vm529_vm5 = vcmp.eq.f32.partialorder %v528_v33, 8.507059e+37 }
 0x536   : > { %636 = vperm.xlu0 %1216, %v634_v25   ;;  %v1168_v25 = vld [vmem:[%s1369_s10 + $0x8] sm:$0x3] }
 0x537   : > { %v1233_v24 = vpop.eup %1232 }
 0x538   : > { %v520_v26 = vmul.f32 %v1233_v24, %v518_v20  ;;  %vm525_vm2 = vweird.f32 %v1233_v24 }
 0x539   : > { %vm526_vm4 = vmor %vm524_vm3, %vm525_vm2 }
 0x53a   : > { %v521_v28 = vsub.f32 1.0, %v520_v26 }
 0x53c   : > { %v522_v30 = vmul.f32 %v1233_v24, %v521_v28 }
 0x53e   : > { %v523_v31 = vadd.f32 %v1233_v24, %v522_v30 }
 0x540   : > { %v527_v34 = vsel %vm526_vm4, %v1233_v24, %v523_v31  ;;  %v712_v24 = vsel %vm711_vm12, 1, %v1293_v29 }
 0x541   : > { %v532_v37 = vsel %vm529_vm5, %v531_v35, %v527_v34 }
 0x542   : > { %v546_v43 = vsub.f32 1.0, %v532_v37  ;;  %v552_v46 = vmul.f32 %v532_v37, %v483_v12 }
 0x598   : > { %v537_v36 = vpop.permute.xlu0 %536 }
 0x599   : > { %v539_v38 = vmul.f32 %v537_v36, %v532_v37 }
 0x59b   : > { %541 = vrot.lane.b32.xlu1 %v539_v38, %s1291_s30 }
 0x5a0   : > { %v559_v45 = vpop.permute.xlu0 %558 }
 0x5a1   : > { %vm560_vm6 = vcmp.eq.s32.totalorder %v559_v45, 1 }
 0x5a8   : > { %v637_v14 = vpop.permute.xlu0 %636 }
 0x5a9   : > { %vm638_vm11 = vcmp.eq.s32.totalorder %v637_v14, 1 }
 0x60d   : > { %v542_v39 = vpop.permute.xlu1 %541 }
 0x60e   : > { %v544_v40 = vadd.f32 %v1161_v16, %v542_v39 }
 0x610   : > { %1234 = vtanh.f32 %v544_v40 }
 0x616   : > { %v1235_v42 = vpop.eup %1234 }
 0x617   : > { %548 = vrot.lane.b32.xlu2 %v1235_v42, %s1294_s14 }
 0x671   : > { %v549_v44 = vpop.permute.xlu2 %548 }
 0x672   : > { %v551_v47 = vmul.f32 %v549_v44, %v546_v43 }
 0x674   : > { %v553_v48 = vadd.f32 %v552_v46, %v551_v47 }
 0x676   : > { %v561_v49 = vsel %vm560_vm6, %v553_v48, %v483_v12  ;;  %v1424_v50 = vsel %vm560_vm6, %v553_v48, 0.0 }
 0x677   : > { %568 = vrot.lane.b32.xlu1 %v561_v49, %s1294_s14 }
 0x6e9   : > { %v569_v51 = vpop.permute.xlu1 %568 }
 0x6ea   : > { %1165 = vmatmul.msk.f32.vlgmr.msra.gmra.mxu3 %vm327_vm1, %v569_v51 }
 0x76d   : > { %v589_v52 = vpop.f32.mrf.mxu3 }
 0x76e   : > { %v612_v53 = vadd.f32 %v589_v52, %v1361_v7  ;;  %v592_v55 = vadd.f32 %v1164_v54, %v589_v52 }
 0x770   : > { %614 = vrot.lane.b32.xlu2 %v612_v53, %s1291_s30  ;;  %v1166_v56 = vmul.f32 -1.442695, %v592_v55 }
 0x772   : > { %1236 = vpow2.f32 %v1166_v56 }
 0x778   : > { %v1237_v57 = vpop.eup %1236 }
 0x779   : > { %v596_v58 = vadd.f32 1.0, %v1237_v57 }
 0x77b   : > { %1238 = vrcp.f32 %v596_v58  ;;  %v608_v0 = vand.u32 2147483648, %v596_v58  ;;  %vm602_vm8 = vweird.f32 %v596_v58  ;;  %v606_v1 = vand.u32 2147483647, %v596_v58 }
 0x77d   : > { %v609_v3 = vor.u32 1.1754944e-38, %v608_v0  ;;  %vm607_vm10 = vcmp.eq.f32.partialorder %v606_v1, 8.507059e+37 }
 0x781   : > { %v1239_v59 = vpop.eup %1238 }
 0x782   : > { %v598_v60 = vmul.f32 %v1239_v59, %v596_v58  ;;  %vm603_vm7 = vweird.f32 %v1239_v59 }
 0x783   : > { %vm604_vm9 = vmor %vm602_vm8, %vm603_vm7 }
 0x784   : > { %v599_v61 = vsub.f32 1.0, %v598_v60  ;;  %v788_v60 = vstv %s720_s28 }
 0x785   : > { %vm789_vm4 = vcmp.lt.s32.totalorder %v788_v60, %v1381_v27 }
 0x786   : > { %v600_v62 = vmul.f32 %v1239_v59, %v599_v61  ;;  %v790_v61 = vsel %vm789_vm4, 1, %v1293_v29 }
 0x788   : > { %v601_v63 = vadd.f32 %v1239_v59, %v600_v62  ;;  %v1171_v62 = vld [vmem:[%s1369_s10 + $0xa] sm:$0x3] }
 0x78a   : > { %v605_v2 = vsel %vm604_vm9, %v1239_v59, %v601_v63 }
 0x78b   : > { %v610_v5 = vsel %vm607_vm10, %v609_v3, %v605_v2 }
 0x78c   : > { %v624_v12 = vsub.f32 1.0, %v610_v5  ;;  %v630_v15 = vmul.f32 %v610_v5, %v561_v49 }
 0x7ca   : > { %v615_v4 = vpop.permute.xlu2 %614 }
 0x7cb   : > { %v617_v6 = vmul.f32 %v615_v4, %v610_v5 }
 0x7cd   : > { %619 = vrot.lane.b32.xlu1 %v617_v6, %s1291_s30 }
 0x83f   : > { %v620_v8 = vpop.permute.xlu1 %619 }
 0x840   : > { %v622_v9 = vadd.f32 %v1164_v54, %v620_v8 }
 0x842   : > { %1240 = vtanh.f32 %v622_v9 }
 0x848   : > { %v1241_v10 = vpop.eup %1240 }
 0x849   : > { %626 = vrot.lane.b32.xlu2 %v1241_v10, %s1294_s14 }
 0x8a3   : > { %v627_v13 = vpop.permute.xlu2 %626 }
 0x8a4   : > { %v629_v16 = vmul.f32 %v627_v13, %v624_v12 }
 0x8a6   : > { %v631_v17 = vadd.f32 %v630_v15, %v629_v16 }
 0x8a8   : > { %v639_v18 = vsel %vm638_vm11, %v631_v17, %v561_v49  ;;  %v1433_v19 = vsel %vm638_vm11, %v631_v17, 0.0 }
 0x8a9   : > { %646 = vrot.lane.b32.xlu1 %v639_v18, %s1294_s14 }
 0x91b   : > { %v647_v20 = vpop.permute.xlu1 %646 }
 0x91c   : > { %1169 = vmatmul.msk.f32.vlgmr.msrb.gmra.mxu0 %vm327_vm1, %v647_v20 }
 0x999   : > { %v667_v21 = vpop.f32.mrf.mxu0 }
 0x99a   : > { %v690_v22 = vadd.f32 %v667_v21, %v1361_v7  ;;  %v670_v26 = vadd.f32 %v1168_v25, %v667_v21 }
 0x99c   : > { %692 = vrot.lane.b32.xlu2 %v690_v22, %s1291_s30  ;;  %v1170_v28 = vmul.f32 -1.442695, %v670_v26 }
 0x99e   : > { %1242 = vpow2.f32 %v1170_v28 }
 0x9a4   : > { %714 = vperm.xlu2 %1214, %v712_v24   ;;  %v1243_v30 = vpop.eup %1242 }
 0x9a5   : > { %v674_v31 = vadd.f32 1.0, %v1243_v30 }
 0x9a7   : > { %1244 = vrcp.f32 %v674_v31  ;;  %v686_v37 = vand.u32 2147483648, %v674_v31  ;;  %vm680_vm14 = vweird.f32 %v674_v31  ;;  %v684_v38 = vand.u32 2147483647, %v674_v31 }
 0x9a9   : > { %v687_v40 = vor.u32 1.1754944e-38, %v686_v37  ;;  %vm685_vm2 = vcmp.eq.f32.partialorder %v684_v38, 8.507059e+37 }
 0x9ad   : > { %v1245_v32 = vpop.eup %1244 }
 0x9ae   : > { %v676_v33 = vmul.f32 %v1245_v32, %v674_v31  ;;  %vm681_vm13 = vweird.f32 %v1245_v32 }
 0x9af   : > { %vm682_vm15 = vmor %vm680_vm14, %vm681_vm13 }
 0x9b0   : > { %v677_v34 = vsub.f32 1.0, %v676_v33 }
 0x9b2   : > { %v678_v35 = vmul.f32 %v1245_v32, %v677_v34  ;;  %v866_v34 = vstv %s798_s7 }
 0x9b3   : > { %vm867_vm10 = vcmp.lt.s32.totalorder %v866_v34, %v1381_v27 }
 0x9b4   : > { %v679_v36 = vadd.f32 %v1245_v32, %v678_v35  ;;  %v868_v35 = vsel %vm867_vm10, 1, %v1293_v29  ;;  %vm994_vm10 = vcmask 1041408  }
 0x9b6   : > { %v683_v39 = vsel %vm682_vm15, %v1245_v32, %v679_v36  ;;  %v1174_v36 = vld [vmem:[%s1369_s10 + $0xc] sm:$0x3] }
 0x9b7   : > { %v688_v43 = vsel %vm685_vm2, %v687_v40, %v683_v39 }
 0x9b8   : > { %v702_v48 = vsub.f32 1.0, %v688_v43  ;;  %v708_v52 = vmul.f32 %v688_v43, %v639_v18 }
 0x9f6   : > { %v693_v42 = vpop.permute.xlu2 %692 }
 0x9f7   : > { %v695_v44 = vmul.f32 %v693_v42, %v688_v43 }
 0x9f9   : > { %697 = vrot.lane.b32.xlu0 %v695_v44, %s1291_s30 }
 0x9fe   : > { %v715_v51 = vpop.permute.xlu2 %714 }
 0x9ff   : > { %vm716_vm3 = vcmp.eq.s32.totalorder %v715_v51, 1 }
 0xa6b   : > { %v698_v45 = vpop.permute.xlu0 %697 }
 0xa6c   : > { %v700_v46 = vadd.f32 %v1168_v25, %v698_v45 }
 0xa6e   : > { %1246 = vtanh.f32 %v700_v46 }
 0xa74   : > { %v1247_v47 = vpop.eup %1246 }
 0xa75   : > { %704 = vrot.lane.b32.xlu1 %v1247_v47, %s1294_s14 }
 0xae7   : > { %v705_v49 = vpop.permute.xlu1 %704 }
 0xae8   : > { %v707_v53 = vmul.f32 %v705_v49, %v702_v48 }
 0xaea   : > { %v709_v54 = vadd.f32 %v708_v52, %v707_v53 }
 0xaec   : > { %v717_v55 = vsel %vm716_vm3, %v709_v54, %v639_v18  ;;  %v1446_v56 = vsel %vm716_vm3, %v709_v54, 0.0 }
 0xaed   : > { %724 = vrot.lane.b32.xlu0 %v717_v55, %s1294_s14 }
 0xb5f   : > { %v725_v57 = vpop.permute.xlu0 %724 }
 0xb60   : > { %1172 = vmatmul.msk.f32.vlgmr.msrb.gmra.mxu1 %vm327_vm1, %v725_v57 }
 0xbdd   : > { %v745_v58 = vpop.f32.mrf.mxu1 }
 0xbde   : > { %v768_v59 = vadd.f32 %v745_v58, %v1361_v7  ;;  %v748_v63 = vadd.f32 %v1171_v62, %v745_v58 }
 0xbe0   : > { %770 = vrot.lane.b32.xlu1 %v768_v59, %s1291_s30  ;;  %v1173_v0 = vmul.f32 -1.442695, %v748_v63 }
 0xbe2   : > { %1248 = vpow2.f32 %v1173_v0 }
 0xbe8   : > { %792 = vperm.xlu1 %1215, %v790_v61   ;;  %v1249_v1 = vpop.eup %1248 }
 0xbe9   : > { %v752_v2 = vadd.f32 1.0, %v1249_v1 }
 0xbeb   : > { %1250 = vrcp.f32 %v752_v2  ;;  %v764_v9 = vand.u32 2147483648, %v752_v2  ;;  %vm758_vm6 = vweird.f32 %v752_v2  ;;  %v762_v10 = vand.u32 2147483647, %v752_v2 }
 0xbed   : > { %v765_v13 = vor.u32 1.1754944e-38, %v764_v9  ;;  %vm763_vm8 = vcmp.eq.f32.partialorder %v762_v10, 8.507059e+37  ;;  %v1177_v9 = vld [vmem:[%s1369_s10 + $0xe] sm:$0x3] }
 0xbf1   : > { %v1251_v3 = vpop.eup %1250 }
 0xbf2   : > { %v754_v4 = vmul.f32 %v1251_v3, %v752_v2  ;;  %vm759_vm5 = vweird.f32 %v1251_v3 }
 0xbf3   : > { %vm760_vm7 = vmor %vm758_vm6, %vm759_vm5 }
 0xbf4   : > { %v755_v5 = vsub.f32 1.0, %v754_v4 }
 0xbf6   : > { %v756_v6 = vmul.f32 %v1251_v3, %v755_v5 }
 0xbf8   : > { %v757_v8 = vadd.f32 %v1251_v3, %v756_v6  ;;  %v944_v6 = vstv %s876_s9 }
 0xbf9   : > { %vm945_vm2 = vcmp.lt.s32.totalorder %v944_v6, %v1381_v27 }
 0xbfa   : > { %v761_v12 = vsel %vm760_vm7, %v1251_v3, %v757_v8  ;;  %v946_v8 = vsel %vm945_vm2, 1, %v1293_v29 }
 0xbfb   : > { %v766_v15 = vsel %vm763_vm8, %v765_v13, %v761_v12  ;;  %vm984_vm8 = vcmask 523264  }
 0xbfc   : > { %v780_v21 = vsub.f32 1.0, %v766_v15  ;;  %v786_v24 = vmul.f32 %v766_v15, %v717_v55 }
 0xc52   : > { %v771_v14 = vpop.permute.xlu1 %770 }
 0xc53   : > { %v773_v16 = vmul.f32 %v771_v14, %v766_v15 }
 0xc55   : > { %775 = vrot.lane.b32.xlu2 %v773_v16, %s1291_s30 }
 0xc5a   : > { %v793_v23 = vpop.permute.xlu1 %792 }
 0xc5b   : > { %vm794_vm9 = vcmp.eq.s32.totalorder %v793_v23, 1 }
 0xcaf   : > { %v776_v17 = vpop.permute.xlu2 %775 }
 0xcb0   : > { %v778_v18 = vadd.f32 %v1171_v62, %v776_v17 }
 0xcb2   : > { %1252 = vtanh.f32 %v778_v18 }
 0xcb8   : > { %v1253_v20 = vpop.eup %1252 }
 0xcb9   : > { %782 = vrot.lane.b32.xlu0 %v1253_v20, %s1294_s14 }
 0xd2b   : > { %v783_v22 = vpop.permute.xlu0 %782 }
 0xd2c   : > { %v785_v25 = vmul.f32 %v783_v22, %v780_v21 }
 0xd2e   : > { %v787_v26 = vadd.f32 %v786_v24, %v785_v25 }
 0xd30   : > { %v795_v28 = vsel %vm794_vm9, %v787_v26, %v717_v55  ;;  %v1459_v30 = vsel %vm794_vm9, %v787_v26, 0.0  ;;  %vm986_vm9 = vcmask 785408  }
 0xd31   : > { %802 = vrot.lane.b32.xlu2 %v795_v28, %s1294_s14 }
 0xd8b   : > { %v803_v31 = vpop.permute.xlu2 %802 }
 0xd8c   : > { %1175 = vmatmul.msk.f32.vlgmr.msrb.gmra.mxu2 %vm327_vm1, %v803_v31 }
 0xe0f   : > { %v823_v32 = vpop.f32.mrf.mxu2 }
 0xe10   : > { %v846_v33 = vadd.f32 %v823_v32, %v1361_v7  ;;  %v826_v37 = vadd.f32 %v1174_v36, %v823_v32 }
 0xe12   : > { %848 = vrot.lane.b32.xlu0 %v846_v33, %s1291_s30  ;;  %v1176_v38 = vmul.f32 -1.442695, %v826_v37 }
 0xe14   : > { %1254 = vpow2.f32 %v1176_v38 }
 0xe1a   : > { %870 = vperm.xlu0 %1216, %v868_v35   ;;  %v1255_v39 = vpop.eup %1254 }
 0xe1b   : > { %v830_v40 = vadd.f32 1.0, %v1255_v39 }
 0xe1d   : > { %1256 = vrcp.f32 %v830_v40  ;;  %v842_v47 = vand.u32 2147483648, %v830_v40  ;;  %vm836_vm12 = vweird.f32 %v830_v40  ;;  %v840_v48 = vand.u32 2147483647, %v830_v40 }
 0xe1f   : > { %v843_v51 = vor.u32 1.1754944e-38, %v842_v47  ;;  %vm841_vm14 = vcmp.eq.f32.partialorder %v840_v48, 8.507059e+37 }
 0xe23   : > { %v1257_v42 = vpop.eup %1256 }
 0xe24   : > { %v832_v43 = vmul.f32 %v1257_v42, %v830_v40  ;;  %vm837_vm11 = vweird.f32 %v1257_v42 }
 0xe25   : > { %vm838_vm13 = vmor %vm836_vm12, %vm837_vm11 }
 0xe26   : > { %v833_v44 = vsub.f32 1.0, %v832_v43 }
 0xe28   : > { %v834_v45 = vmul.f32 %v1257_v42, %v833_v44 }
 0xe2a   : > { %v835_v46 = vadd.f32 %v1257_v42, %v834_v45 }
 0xe2c   : > { %v839_v49 = vsel %vm838_vm13, %v1257_v42, %v835_v46 }
 0xe2d   : > { %v844_v53 = vsel %vm841_vm14, %v843_v51, %v839_v49 }
 0xe2e   : > { %v858_v59 = vsub.f32 1.0, %v844_v53  ;;  %v864_v62 = vmul.f32 %v844_v53, %v795_v28 }
 0xe84   : > { %v849_v52 = vpop.permute.xlu0 %848 }
 0xe85   : > { %v851_v54 = vmul.f32 %v849_v52, %v844_v53 }
 0xe87   : > { %853 = vrot.lane.b32.xlu1 %v851_v54, %s1291_s30 }
 0xe8c   : > { %v871_v61 = vpop.permute.xlu0 %870 }
 0xe8d   : > { %vm872_vm15 = vcmp.eq.s32.totalorder %v871_v61, 1 }
 0xef9   : > { %v854_v55 = vpop.permute.xlu1 %853 }
 0xefa   : > { %v856_v57 = vadd.f32 %v1174_v36, %v854_v55 }
 0xefc   : > { %1258 = vtanh.f32 %v856_v57 }
 0xf02   : > { %v1259_v58 = vpop.eup %1258 }
 0xf03   : > { %860 = vrot.lane.b32.xlu2 %v1259_v58, %s1294_s14 }
 0xf5d   : > { %v861_v60 = vpop.permute.xlu2 %860 }
 0xf5e   : > { %v863_v63 = vmul.f32 %v861_v60, %v858_v59 }
 0xf60   : > { %v865_v0 = vadd.f32 %v864_v62, %v863_v63 }
 0xf62   : > { %v873_v1 = vsel %vm872_vm15, %v865_v0, %v795_v28  ;;  %v874_v2 = vsel %vm872_vm15, %v865_v0, 0.0 }
 0xf63   : > { %880 = vrot.lane.b32.xlu1 %v873_v1, %s1294_s14 }
 0xfd5   : > { %v881_v3 = vpop.permute.xlu1 %880 }
 0xfd6   : > { %1178 = vmatmul.msk.f32.vlgmr.msrb.gmra.mxu3 %vm327_vm1, %v881_v3 }
0x1059   : > { %v901_v4 = vpop.f32.mrf.mxu3 }
0x105a   : > { %v924_v5 = vadd.f32 %v901_v4, %v1361_v7  ;;  %v904_v10 = vadd.f32 %v1177_v9, %v901_v4 }
0x105c   : > { %926 = vrot.lane.b32.xlu2 %v924_v5, %s1291_s30  ;;  %v1179_v12 = vmul.f32 -1.442695, %v904_v10 }
0x105e   : > { %1260 = vpow2.f32 %v1179_v12 }
0x1064   : > { %948 = vperm.xlu2 %1214, %v946_v8   ;;  %v1261_v13 = vpop.eup %1260 }
0x1065   : > { %v908_v7 = vadd.f32 1.0, %v1261_v13 }
0x1067   : > { %1262 = vrcp.f32 %v908_v7  ;;  %v920_v29 = vand.u32 2147483648, %v908_v7  ;;  %vm914_vm4 = vweird.f32 %v908_v7  ;;  %v918_v18 = vand.u32 2147483647, %v908_v7 }
0x1069   : > { %v921_v20 = vor.u32 1.1754944e-38, %v920_v29  ;;  %vm919_vm6 = vcmp.eq.f32.partialorder %v918_v18, 8.507059e+37 }
0x106c   : > { %960 = vrot.lane.b32.xlu2 %v1390_v41, %s1294_s14 }
0x106d   : > { %v1263_v14 = vpop.eup %1262 }
0x106e   : > { %v910_v15 = vmul.f32 %v1263_v14, %v908_v7  ;;  %vm915_vm3 = vweird.f32 %v1263_v14 }
0x106f   : > { %vm916_vm5 = vmor %vm914_vm4, %vm915_vm3 }
0x1070   : > { %v911_v16 = vsub.f32 1.0, %v910_v15 }
0x1072   : > { %v912_v27 = vmul.f32 %v1263_v14, %v911_v16 }
0x1074   : > { %968 = vrot.lane.b32.xlu2 %v1433_v19, %s1291_s30  ;;  %v913_v17 = vadd.f32 %v1263_v14, %v912_v27 }
0x1076   : > { %v917_v41 = vsel %vm916_vm5, %v1263_v14, %v913_v17 }
0x1077   : > { %v922_v21 = vsel %vm919_vm6, %v921_v20, %v917_v41 }
0x1078   : > { %v936_v26 = vsub.f32 1.0, %v922_v21  ;;  %v942_v32 = vmul.f32 %v922_v21, %v873_v1 }
0x10b6   : > { %v927_v19 = vpop.permute.xlu2 %926 }
0x10b7   : > { %v929_v22 = vmul.f32 %v927_v19, %v922_v21 }
0x10b9   : > { %931 = vrot.lane.b32.xlu0 %v929_v22, %s1291_s30 }
0x10be   : > { %v949_v31 = vpop.permute.xlu2 %948 }
0x10bf   : > { %vm950_vm7 = vcmp.eq.s32.totalorder %v949_v31, 1 }
0x10c1   : > { %972 = vrot.lane.b32.xlu0 %v1446_v56, %s1294_s14 }
0x10c6   : > { %v961_v37 = vpop.permute.xlu2 %960 }
0x10c7   : > { %v983_v39 = vsel %vm327_vm1, %v961_v37, %v1407_v11 }
0x10ce   : > { %v969_v46 = vpop.permute.xlu2 %968 }
0x112b   : > { %v932_v23 = vpop.permute.xlu0 %931 }
0x112c   : > { %v934_v24 = vadd.f32 %v1177_v9, %v932_v23 }
0x112e   : > { %1264 = vtanh.f32 %v934_v24 }
0x1133   : > { %v973_v38 = vpop.permute.xlu0 %972 }
0x1134   : > { %v1265_v25 = vpop.eup %1264  ;;  %v988_v40 = vsel %vm327_vm1, %v973_v38, %v1459_v30 }
0x1135   : > { %938 = vrot.lane.b32.xlu1 %v1265_v25, %s1294_s14 }
0x113d   : > { %976 = vrot.lane.b32.xlu1 %v874_v2, %s1292_s6 }
0x1145   : > { %964 = vrot.lane.b32.xlu1 %v1424_v50, %s1292_s6  ;;  %s1184_s6 = sshll.u32 %s1348_s22, 2 }
0x1146   : > { %s303_s11 = scalar_lea.vmem %s1521_s4, %s1184_s6 }
0x11a7   : > { %v939_v28 = vpop.permute.xlu1 %938 }
0x11a8   : > { %v941_v33 = vmul.f32 %v939_v28, %v936_v26 }
0x11aa   : > { %v943_v34 = vadd.f32 %v942_v32, %v941_v33 }
0x11ac   : > { %v952_v56 = vsel %vm950_vm7, %v943_v34, 0.0  ;;  %v951_v35 = vsel %vm950_vm7, %v943_v34, %v873_v1 }
0x11ad   : > { %980 = vrot.lane.b32.xlu0 %v952_v56, %s1291_s30 }
0x11af   : > { %v977_v36 = vpop.permute.xlu1 %976 }
0x11b0   : > { %v989_v42 = vsel %vm984_vm8, %v988_v40, %v977_v36 }
0x11b5   : > { %954 = vrot.lane.b32.xlu0 %v951_v35, %s1294_s14 }
0x11b7   : > { %v965_v50 = vpop.permute.xlu1 %964 }
0x11b8   : > { %v985_v43 = vsel %vm984_vm8, %v983_v39, %v965_v50 }
0x11b9   : > { %v987_v48 = vsel %vm986_vm9, %v985_v43, %v969_v46 }
0x121f   : > { %v981_v44 = vpop.permute.xlu0 %980 }
0x1220   : > { %v990_v45 = vsel %vm986_vm9, %v989_v42, %v981_v44 }
0x1221   : > { %v993_v47 = vrot.slane %v990_v45, 6 }
0x1223   : > { %v995_v49 = vsel %vm994_vm10, %v987_v48, %v993_v47 }
0x1224   : > { %997 = vst [vmem:[%s303_s11] sm:$0xf] %v995_v49 }
0x1227   : > { %v955_v11 = vpop.permute.xlu0 %954 }
0x1228   : > { %958 = vst.msk [vmem:[#allocation2] sm:$0x3] %vm312_vm0, %v955_v11 }
0x1229   : > { %1001 = vst.msk [vmem:[%s307_s15] sm:$0x3] %vm312_vm0, %v955_v11 }
0x122a PF: > { %s16_s20 = sadd.s32 1, %s1288_s20   ;;  %s1523_s18 = smov %s1284_s19 }
0x122b   : > { %p13_p6 = scmp.ge.s32.totalorder %s16_s20, 4   ;;  %s1524_s19 = smov %s1526_s21 }
0x122d   :  { %15 = sbr.rel (!%p13_p6) target bundleno = 2 (0x2), region = 99 }

</bundles_post_ra>
